<compile_context>
chip_gen: v6e
topology: v6e:2x2x1
jax: 0.10.0
libtpu: 0.0.40
codegen_flags: <defaults>
</compile_context>

<pallas_src>
import functools

import jax
import jax.numpy as jnp
from jax import lax
from jax.experimental import pallas as pl
from jax.experimental.pallas import tpu as pltpu


def _round_up(x, m):
    return (x + m - 1) // m * m


def _vmem_limit_bytes():
    # Per-generation scoped-VMEM budget: ~3/4 of physical per-core VMEM
    # (~96 MiB on v5e/v6e, ~48 MiB on v7x), with a conservative fallback.
    try:
        cap = int(pltpu.get_tpu_info().vmem_capacity_bytes)
    except Exception:
        cap = 64 * 1024 * 1024
    return (cap * 3) // 4


def _bow_attn_kernel(ids_ref, tbl_ref, out_ref, *, hidden):
    # ids_ref: (Bm, T)  int32  token ids for this batch tile              (VMEM)
    # tbl_ref: (Vp, Hp) bf16   zero-padded embedding table, resident; its
    #                          column `hidden` holds the precomputed
    #                          attention logit  s[v] = emb[v] @ w + b     (VMEM)
    # out_ref: (Bm, Hp) f32    attention-pooled embeddings for this tile
    ids = ids_ref[...]                                       # (Bm, T)
    tbl = tbl_ref[...]                                       # (Vp, Hp) bf16
    bm, t = ids.shape
    vp, hp = tbl.shape

    # --- fused gather + projection on the MXU: one_hot(ids) @ table ---------
    # Compare in int32, cast only the dot operands to bf16 (f32 accumulation).
    vocab_iota = lax.broadcasted_iota(jnp.int32, (bm, t, vp), 2)
    one_hot = (ids[:, :, None] == vocab_iota).astype(jnp.bfloat16)
    one_hot = one_hot.reshape(bm * t, vp)        # layout-preserving (T % 8 == 0)
    emb2d = jnp.dot(one_hot, tbl,
                    preferred_element_type=jnp.float32)      # (Bm*T, Hp) f32

    # --- attention logits came along for free in padded column `hidden` -----
    logits = emb2d[:, hidden:hidden + 1]                     # (Bm*T, 1)
    att = jnp.tanh(logits).reshape(bm, t, 1)                 # (Bm, T, 1)

    # --- numerically stable softmax over T (dim=1 in the PyTorch module) ----
    # Exact divide: the denominator is only (Bm, 1, 1).
    m = jnp.max(att, axis=1, keepdims=True)
    e = jnp.exp(att - m)
    att = e / jnp.sum(e, axis=1, keepdims=True)              # (Bm, T, 1)

    # --- weighted pooling, kept in the 2D layout the matmul produced --------
    weighted = emb2d * att.reshape(bm * t, 1)                # sublane broadcast
    out_ref[...] = jnp.sum(weighted.reshape(bm, t, hp), axis=1)   # (Bm, Hp)


def prepare_bow_params(emb_table, attn_w, attn_b):
    """One-time parameter packing (hoisted out of the forward path).

    Returns a zero-padded bf16 table of shape (Vp, Hp) whose column H holds
    the precomputed per-vocab attention logit emb[v] @ w + b, plus H.
    """
    V, H = emb_table.shape
    Hp = _round_up(H + 1, 128)      # +1 spare lane for the fused logit column
    Vp = _round_up(V, 128)

    emb_f32 = emb_table.astype(jnp.float32)
    s = emb_f32 @ attn_w.reshape(H).astype(jnp.float32) \
        + attn_b.reshape(()).astype(jnp.float32)             # (V,)

    tbl = jnp.zeros((Vp, Hp), jnp.float32)
    tbl = tbl.at[:V, :H].set(emb_f32)
    tbl = tbl.at[:V, H].set(s)
    # bf16 table: full-rate MXU gather on all generations, half the VMEM.
    return tbl.astype(jnp.bfloat16), H


@functools.partial(jax.jit, static_argnames=("hidden", "block_b"))
def bag_of_words_forward(token_ids, packed_table, *, hidden, block_b=32):
    """
    token_ids:    (B, T) int32
    packed_table: (Vp, Hp) bfloat16   from prepare_bow_params
    hidden:       original hidden size H (static)
    returns:      (B, H) float32
    """
    B, T = token_ids.shape
    Vp, Hp = packed_table.shape
    assert T % 8 == 0, "T must be a multiple of 8 for layout-preserving reshapes"

    Bp = _round_up(B, block_b)
    ids = jnp.zeros((Bp, T), jnp.int32).at[:B].set(token_ids.astype(jnp.int32))

    grid = (Bp // block_b,)
    out = pl.pallas_call(
        functools.partial(_bow_attn_kernel, hidden=hidden),
        out_shape=jax.ShapeDtypeStruct((Bp, Hp), jnp.float32),
        grid=grid,
        in_specs=[
            # per-step batch tile of token ids (lane-dense (Bm, T) block)
            pl.BlockSpec((block_b, T), lambda i: (i, 0)),
            # packed embedding table: constant block index -> resident in VMEM
            pl.BlockSpec((Vp, Hp), lambda i: (0, 0)),
        ],
        out_specs=pl.BlockSpec((block_b, Hp), lambda i: (i, 0)),
        compiler_params=pltpu.CompilerParams(
            dimension_semantics=("parallel",),     # shard batch steps on v7x TCs
            vmem_limit_bytes=_vmem_limit_bytes(),  # per-generation VMEM budget
        ),
    )(ids, packed_table)

    return out[:B, :hidden]


def _reference(token_ids, emb_table, attn_w, attn_b):
    emb = jnp.take(emb_table, token_ids, axis=0)                     # (B, T, H)
    logits = jnp.einsum('bth,h->bt', emb, attn_w[0]) + attn_b[0]     # (B, T)
    att = jax.nn.softmax(jnp.tanh(logits), axis=1)[:, :, None]       # (B, T, 1)
    return jnp.sum(att * emb, axis=1)                                # (B, H)


if __name__ == "__main__":
    key = jax.random.PRNGKey(0)
    k_ids, k_emb, k_w, k_b = jax.random.split(key, 4)

    B, T, H, V = 16, 8, 32, 50
    # NOTE: nn.init.xavier_uniform_ in the PyTorch __init__ overwrites the
    # padding row of the embedding, so no zeroing of the pad row is needed.

    token_ids = jax.random.randint(k_ids, (B, T), 0, V, dtype=jnp.int32)

    # Xavier-uniform embedding table.
    bound_emb = (6.0 / (V + H)) ** 0.5
    emb_table = jax.random.uniform(k_emb, (V, H), jnp.float32, -bound_emb, bound_emb)

    # Linear(H, 1) params (torch default init bounds).
    bound_w = (1.0 / H) ** 0.5
    attn_w = jax.random.uniform(k_w, (1, H), jnp.float32, -bound_w, bound_w)
    attn_b = jax.random.uniform(k_b, (1,), jnp.float32, -bound_w, bound_w)

    packed_table, hidden = prepare_bow_params(emb_table, attn_w, attn_b)

    out = bag_of_words_forward(token_ids, packed_table, hidden=hidden)
    out = jax.block_until_ready(out)

    ref = _reference(token_ids, emb_table, attn_w, attn_b)
    assert out.shape == (B, H)
    # Tolerance accounts for the bf16-rounded embedding table / fused logits
    # used by the MXU gather (accumulation and everything after is f32).
    assert jnp.allclose(out, ref, atol=3e-3, rtol=3e-2), (out, ref)

    print("KERNEL_OK")
</pallas_src>

<mosaic_0001>
module attributes {stable_mosaic.version = 11 : i64} {
  func.func @_bow_attn_kernel(%arg0: i32, %arg1: memref<32x8xi32, #tpu.memory_space<vmem>>, %arg2: memref<128x128xbf16, #tpu.memory_space<vmem>>, %arg3: memref<32x128xf32, #tpu.memory_space<vmem>>) attributes {dimension_semantics = [#tpu.dimension_semantics<parallel>], iteration_bounds = array<i64: 1>, scalar_prefetch = 0 : i64, scratch_operands = 0 : i64, tpu.core_type = #tpu.core_type<tc>, window_params = [{transform_indices = @transform_0, window_bounds = array<i64: 32, 8>}, {pipeline_mode = #tpu.pipeline_mode<synchronous>, transform_indices = @transform_1, window_bounds = array<i64: 128, 128>}, {transform_indices = @transform_2, window_bounds = array<i64: 32, 128>}]} {
    %c0 = arith.constant 0 : index
    %c0_0 = arith.constant 0 : index
    %0 = vector.load %arg1[%c0, %c0_0] : memref<32x8xi32, #tpu.memory_space<vmem>>, vector<32x8xi32>
    %c0_1 = arith.constant 0 : index
    %c0_2 = arith.constant 0 : index
    %1 = vector.load %arg2[%c0_1, %c0_2] : memref<128x128xbf16, #tpu.memory_space<vmem>>, vector<128x128xbf16>
    %2 = tpu.iota {dimensions = array<i32: 2>} : vector<32x8x128xi32>
    %3 = vector.shape_cast %0 : vector<32x8xi32> to vector<32x8x1xi32>
    %4 = vector.broadcast %3 : vector<32x8x1xi32> to vector<32x8x128xi32>
    %5 = arith.cmpi eq, %4, %2 : vector<32x8x128xi32>
    %6 = arith.extui %5 : vector<32x8x128xi1> to vector<32x8x128xi32>
    %7 = arith.sitofp %6 : vector<32x8x128xi32> to vector<32x8x128xf32>
    %8 = arith.truncf %7 : vector<32x8x128xf32> to vector<32x8x128xbf16>
    %9 = vector.shape_cast %8 : vector<32x8x128xbf16> to vector<256x128xbf16>
    %cst = arith.constant dense<0.000000e+00> : vector<256x128xf32>
    %10 = tpu.matmul %9, %1, %cst {dimension_numbers = #tpu.dot_dimension_numbers<[1], [0], [0], [1], [0, 0, 1, 1], [], []>} : vector<256x128xbf16>, vector<128x128xbf16>, vector<256x128xf32> -> vector<256x128xf32>
    %11 = vector.extract_strided_slice %10 {offsets = [0, 32], sizes = [256, 1], strides = [1, 1]} : vector<256x128xf32> to vector<256x1xf32>
    %12 = math.tanh %11 : vector<256x1xf32>
    %13 = vector.shape_cast %12 : vector<256x1xf32> to vector<32x8x1xf32>
    %cst_3 = arith.constant dense<0xFF800000> : vector<32x1xf32>
    %14 = vector.multi_reduction <maximumf>, %13, %cst_3 [1] : vector<32x8x1xf32> to vector<32x1xf32>
    %15 = vector.shape_cast %14 : vector<32x1xf32> to vector<32x1x1xf32>
    %16 = vector.broadcast %15 : vector<32x1x1xf32> to vector<32x8x1xf32>
    %17 = arith.subf %13, %16 : vector<32x8x1xf32>
    %18 = math.exp %17 : vector<32x8x1xf32>
    %cst_4 = arith.constant dense<0.000000e+00> : vector<32x1xf32>
    %19 = vector.multi_reduction <add>, %18, %cst_4 [1] : vector<32x8x1xf32> to vector<32x1xf32>
    %20 = vector.shape_cast %19 : vector<32x1xf32> to vector<32x1x1xf32>
    %21 = vector.broadcast %20 : vector<32x1x1xf32> to vector<32x8x1xf32>
    %22 = arith.divf %18, %21 : vector<32x8x1xf32>
    %23 = vector.shape_cast %22 : vector<32x8x1xf32> to vector<256x1xf32>
    %24 = vector.broadcast %23 : vector<256x1xf32> to vector<256x128xf32>
    %25 = arith.mulf %10, %24 : vector<256x128xf32>
    %26 = vector.shape_cast %25 : vector<256x128xf32> to vector<32x8x128xf32>
    %cst_5 = arith.constant dense<0.000000e+00> : vector<32x128xf32>
    %27 = vector.multi_reduction <add>, %26, %cst_5 [1] : vector<32x8x128xf32> to vector<32x128xf32>
    %c0_6 = arith.constant 0 : index
    %c0_7 = arith.constant 0 : index
    %28 = vector.load %arg3[%c0_6, %c0_7] : memref<32x128xf32, #tpu.memory_space<vmem>>, vector<32x128xf32>
    tpu.vector_store %arg3[%c0_6, %c0_7], %27 {strides = array<i32>} : memref<32x128xf32, #tpu.memory_space<vmem>>, vector<32x128xf32>,
    return
  }
  func.func @transform_0(%arg0: i32) -> (i32, i32) {
    %c0_i32 = arith.constant 0 : i32
    %c0_i32_0 = arith.constant 0 : i32
    return %arg0, %c0_i32 : i32, i32
  }
  func.func @transform_1(%arg0: i32) -> (i32, i32) {
    %c0_i32 = arith.constant 0 : i32
    %c0_i32_0 = arith.constant 0 : i32
    %c0_i32_1 = arith.constant 0 : i32
    return %c0_i32, %c0_i32_0 : i32, i32
  }
  func.func @transform_2(%arg0: i32) -> (i32, i32) {
    %c0_i32 = arith.constant 0 : i32
    %c0_i32_0 = arith.constant 0 : i32
    return %arg0, %c0_i32 : i32, i32
  }
}

</mosaic_0001>

<bundles_post_ra>
// kernel: bag_of_words_forward.1
= control target key start
LH: loop header
LB: loop body
LE: loop exit
PB: predicated region body
PF: predicated region fallthrough
CT: control target
= control target key end

     0   :  { %v32_v0 = vlaneseq  ;;  %v2191_v59 = vmov 1.0|1.0   ;;  %s2877_s0 = inlined_call_operand.vmem [shape: s32[32,8], index: 0, kind: input, shape index: {}]   ;;  %s2878_s1 = inlined_call_operand.vmem [shape: bf16[128,128], index: 1, kind: input, shape index: {}]   ;;  %s2879_s2 = inlined_call_operand.vmem [shape: f32[32,128], index: 2, kind: output, shape index: {}]  }
   0x1   :  { %v2211_v1 = vld [vmem:[%s2877_s0 + $0x10] sm:$0xff]  ;;  %v2217_v3 = vld [vmem:[%s2877_s0] sm:$0xff]  ;;  %v1991_v4 = vld [vmem:[%s2878_s1 + $0x38] sm:$0xff]  }
   0x2   :  { %v35_v2 = vshrl.u32 %v32_v0, 7  ;;  %1923 = vmatprep.subr.bf16.mxu0 %v1991_v4  ;;  %1971 = vmatprep.subr.bf16.mxu1 %v1991_v4  ;;  %v1992_v7 = vld [vmem:[%s2878_s1 + $0x30] sm:$0xff]   ;;  %v1993_v8 = vld [vmem:[%s2878_s1 + $0x28] sm:$0xff]   ;;  %v1994_v15 = vld [vmem:[%s2878_s1 + $0x20] sm:$0xff]   ;;  %v2302_v56 = vand.u32 127, %v32_v0 }
   0x3   :  { %1924 = vmatpush3.bf16.msra.mxu0 %v1991_v4  ;;  %1979 = vmatpush3.bf16.msra.mxu1 %v1991_v4  ;;  %v1995_v18 = vld [vmem:[%s2878_s1 + $0x18] sm:$0xff]   ;;  %v1996_v23 = vld [vmem:[%s2878_s1 + $0x10] sm:$0xff]   ;;  %v1997_v26 = vld [vmem:[%s2878_s1 + $0x8] sm:$0xff]  }
   0x4   :  { %v2222_v5 = vsub.s32 0, %v35_v2  ;;  %v2224_v6 = vsub.s32 1, %v35_v2  ;;  %1925 = vmatprep.subr.bf16.mxu0 %v1992_v7  ;;  %1972 = vmatprep.subr.bf16.mxu1 %v1992_v7  ;;  %v2240_v13 = vsub.s32 3, %v35_v2  ;;  %v2242_v14 = vsub.s32 2, %v35_v2  ;;  %v1998_v31 = vld [vmem:[%s2878_s1] sm:$0xff]   ;;  %v13_v36 = vld [vmem:[%s2877_s0 + $0x8] sm:$0xff] }
   0x5   :  { %v2258_v21 = vsub.s32 5, %v35_v2  ;;  %v2260_v22 = vsub.s32 4, %v35_v2  ;;  %v85_v29 = vsub.s32 7, %v35_v2  ;;  %v78_v30 = vsub.s32 6, %v35_v2  ;;  %v15_v39 = vld [vmem:[%s2877_s0 + $0x18] sm:$0xff] }
   0x6   :  { %v149_v9 = vrot.slane %v2211_v1, %v2222_v5  ;;  %v37_v10 = vrot.slane %v2217_v3, %v2222_v5  ;;  %v156_v11 = vrot.slane %v2211_v1, %v2224_v6  ;;  %v44_v12 = vrot.slane %v2217_v3, %v2224_v6 }
   0x7   :  { %1926 = vmatpush3.bf16.msra.mxu0 %v1992_v7  ;;  %1980 = vmatpush3.bf16.msra.mxu1 %v1992_v7  ;;  %v58_v16 = vrot.slane %v2217_v3, %v2240_v13  ;;  %v51_v17 = vrot.slane %v2217_v3, %v2242_v14  ;;  %v170_v19 = vrot.slane %v2211_v1, %v2240_v13 }
   0x8   :  { %151 = vbcast.lane.b32.xlu1 %v149_v9, 256  ;;  %39 = vbcast.lane.b32.xlu0 %v37_v10, 256  ;;  %v163_v20 = vrot.slane %v2211_v1, %v2242_v14  ;;  %v72_v24 = vrot.slane %v2217_v3, %v2258_v21  ;;  %v65_v25 = vrot.slane %v2217_v3, %v2260_v22 }
   0x9   :  { %1927 = vmatprep.subr.bf16.mxu0 %v1993_v8  ;;  %1973 = vmatprep.subr.bf16.mxu1 %v1993_v8  ;;  %v184_v27 = vrot.slane %v2211_v1, %v2258_v21  ;;  %v177_v28 = vrot.slane %v2211_v1, %v2260_v22  ;;  %v86_v32 = vrot.slane %v2217_v3, %v85_v29 }
   0xa   :  { %v79_v33 = vrot.slane %v2217_v3, %v78_v30  ;;  %v198_v34 = vrot.slane %v2211_v1, %v85_v29  ;;  %v191_v35 = vrot.slane %v2211_v1, %v78_v30  ;;  %v100_v37 = vrot.slane %v13_v36, %v2224_v6 }
   0xb   :  { %1928 = vmatpush3.bf16.msra.mxu0 %v1993_v8  ;;  %1981 = vmatpush3.bf16.msra.mxu1 %v1993_v8  ;;  %v93_v38 = vrot.slane %v13_v36, %v2222_v5  ;;  %v212_v40 = vrot.slane %v15_v39, %v2224_v6  ;;  %v205_v41 = vrot.slane %v15_v39, %v2222_v5 }
   0xc   :  { %158 = vbcast.lane.b32.xlu1 %v156_v11, 256  ;;  %46 = vbcast.lane.b32.xlu0 %v44_v12, 256  ;;  %v114_v42 = vrot.slane %v13_v36, %v2240_v13  ;;  %v107_v43 = vrot.slane %v13_v36, %v2242_v14  ;;  %v226_v44 = vrot.slane %v15_v39, %v2240_v13 }
   0xd   :  { %1929 = vmatprep.subr.bf16.mxu0 %v1994_v15  ;;  %1974 = vmatprep.subr.bf16.mxu1 %v1994_v15  ;;  %v219_v45 = vrot.slane %v15_v39, %v2242_v14  ;;  %v128_v46 = vrot.slane %v13_v36, %v2258_v21  ;;  %v121_v47 = vrot.slane %v13_v36, %v2260_v22 }
   0xe   :  { %v240_v48 = vrot.slane %v15_v39, %v2258_v21  ;;  %v233_v49 = vrot.slane %v15_v39, %v2260_v22  ;;  %v142_v50 = vrot.slane %v13_v36, %v85_v29  ;;  %v135_v51 = vrot.slane %v13_v36, %v78_v30 }
   0xf   :  { %1930 = vmatpush3.bf16.msra.mxu0 %v1994_v15  ;;  %1982 = vmatpush3.bf16.msra.mxu1 %v1994_v15  ;;  %v254_v52 = vrot.slane %v15_v39, %v85_v29  ;;  %v247_v53 = vrot.slane %v15_v39, %v78_v30 }
  0x10   :  { %60 = vbcast.lane.b32.xlu1 %v58_v16, 256  ;;  %53 = vbcast.lane.b32.xlu0 %v51_v17, 256 }
  0x11   :  { %1931 = vmatprep.subr.bf16.mxu0 %v1995_v18  ;;  %1975 = vmatprep.subr.bf16.mxu1 %v1995_v18 }
  0x13   :  { %1932 = vmatpush3.bf16.msra.mxu0 %v1995_v18  ;;  %1983 = vmatpush3.bf16.msra.mxu1 %v1995_v18 }
  0x14   :  { %172 = vbcast.lane.b32.xlu1 %v170_v19, 256  ;;  %165 = vbcast.lane.b32.xlu0 %v163_v20, 256 }
  0x15   :  { %1933 = vmatprep.subr.bf16.mxu0 %v1996_v23  ;;  %1976 = vmatprep.subr.bf16.mxu1 %v1996_v23 }
  0x17   :  { %1934 = vmatpush3.bf16.msra.mxu0 %v1996_v23  ;;  %1984 = vmatpush3.bf16.msra.mxu1 %v1996_v23 }
  0x18   :  { %74 = vbcast.lane.b32.xlu1 %v72_v24, 256  ;;  %67 = vbcast.lane.b32.xlu0 %v65_v25, 256  ;;  %v2192_v24 = vmov 32  }
  0x19   :  { %1935 = vmatprep.subr.bf16.mxu0 %v1997_v26  ;;  %1977 = vmatprep.subr.bf16.mxu1 %v1997_v26 }
  0x1a   :  { %1989 = vset.pattern.permute.xlu1 %v2192_v24  ;;  %1990 = vset.pattern.permute.xlu0 %v2192_v24 }
  0x1b   :  { %1936 = vmatpush3.bf16.msra.mxu0 %v1997_v26  ;;  %1985 = vmatpush3.bf16.msra.mxu1 %v1997_v26 }
  0x1c   :  { %186 = vbcast.lane.b32.xlu1 %v184_v27, 256  ;;  %179 = vbcast.lane.b32.xlu0 %v177_v28, 256 }
  0x1d   :  { %1937 = vmatprep.subr.bf16.mxu0 %v1998_v31  ;;  %1978 = vmatprep.subr.bf16.mxu1 %v1998_v31 }
  0x1f   :  { %1938 = vmatpush3.bf16.msra.mxu0 %v1998_v31  ;;  %1986 = vmatpush3.bf16.msra.mxu1 %v1998_v31 }
  0x20   :  { %88 = vbcast.lane.b32.xlu1 %v86_v32, 256  ;;  %81 = vbcast.lane.b32.xlu0 %v79_v33, 256 }
  0x24   :  { %200 = vbcast.lane.b32.xlu1 %v198_v34, 256  ;;  %193 = vbcast.lane.b32.xlu0 %v191_v35, 256 }
  0x28   :  { %102 = vbcast.lane.b32.xlu1 %v100_v37, 256  ;;  %95 = vbcast.lane.b32.xlu0 %v93_v38, 256 }
  0x2c   :  { %214 = vbcast.lane.b32.xlu1 %v212_v40, 256  ;;  %207 = vbcast.lane.b32.xlu0 %v205_v41, 256 }
  0x30   :  { %116 = vbcast.lane.b32.xlu1 %v114_v42, 256  ;;  %109 = vbcast.lane.b32.xlu0 %v107_v43, 256 }
  0x34   :  { %228 = vbcast.lane.b32.xlu1 %v226_v44, 256  ;;  %221 = vbcast.lane.b32.xlu0 %v219_v45, 256 }
  0x38   :  { %130 = vbcast.lane.b32.xlu1 %v128_v46, 256  ;;  %123 = vbcast.lane.b32.xlu0 %v121_v47, 256 }
  0x3c   :  { %242 = vbcast.lane.b32.xlu1 %v240_v48, 256  ;;  %235 = vbcast.lane.b32.xlu0 %v233_v49, 256 }
  0x40   :  { %144 = vbcast.lane.b32.xlu1 %v142_v50, 256  ;;  %137 = vbcast.lane.b32.xlu0 %v135_v51, 256 }
  0x44   :  { %256 = vbcast.lane.b32.xlu1 %v254_v52, 256  ;;  %249 = vbcast.lane.b32.xlu0 %v247_v53, 256 }
  0x7a   :  { %v152_v54 = vpop.permute.xlu1 %151  ;;  %v40_v55 = vpop.permute.xlu0 %39 }
  0x7b   :  { %vm258_vm0 = vcmp.eq.s32.totalorder %v40_v55, %v2302_v56  ;;  %vm274_vm3 = vcmp.eq.s32.totalorder %v152_v54, %v2302_v56 }
  0x7e   :  { %v159_v57 = vpop.permute.xlu1 %158  ;;  %v47_v58 = vpop.permute.xlu0 %46 }
  0x7f   :  { %vm275_vm1 = vcmp.eq.s32.totalorder %v159_v57, %v2302_v56  ;;  %vm259_vm2 = vcmp.eq.s32.totalorder %v47_v58, %v2302_v56 }
  0x80   :  { %vm1867_vm4 = vmpackc.low %vm259_vm2, %vm258_vm0 }
  0x81   :  { %1939 = vmatprep.mubr.msk.bf16.mxu0 %vm1867_vm4, %v2191_v59  ;;  %vm1883_vm5 = vmpackc.low %vm275_vm1, %vm274_vm3 }
  0x82   :  { %1955 = vmatprep.mubr.msk.bf16.mxu1 %vm1883_vm5, %v2191_v59  ;;  %v61_v60 = vpop.permute.xlu1 %60  ;;  %v54_v61 = vpop.permute.xlu0 %53 }
  0x83   :  { %vm261_vm6 = vcmp.eq.s32.totalorder %v61_v60, %v2302_v56  ;;  %vm260_vm7 = vcmp.eq.s32.totalorder %v54_v61, %v2302_v56 }
  0x84   :  { %vm1869_vm8 = vmpackc.low %vm261_vm6, %vm260_vm7 }
  0x85   :  { %1940 = vmatmul.mubr.msk.bf16.vlgmr.msra.gmra.mxu0 %vm1869_vm8, %v2191_v59 }
  0x86   :  { %v173_v62 = vpop.permute.xlu1 %172  ;;  %v166_v63 = vpop.permute.xlu0 %165 }
  0x87   :  { %vm277_vm9 = vcmp.eq.s32.totalorder %v173_v62, %v2302_v56  ;;  %vm276_vm10 = vcmp.eq.s32.totalorder %v166_v63, %v2302_v56 }
  0x88   :  { %vm1885_vm11 = vmpackc.low %vm277_vm9, %vm276_vm10 }
  0x89   :  { %1956 = vmatmul.mubr.msk.bf16.vlgmr.msra.gmra.mxu1 %vm1885_vm11, %v2191_v59 }
  0x8a   :  { %v75_v0 = vpop.permute.xlu1 %74  ;;  %v68_v1 = vpop.permute.xlu0 %67 }
  0x8b   :  { %vm263_vm12 = vcmp.eq.s32.totalorder %v75_v0, %v2302_v56  ;;  %vm262_vm13 = vcmp.eq.s32.totalorder %v68_v1, %v2302_v56 }
  0x8c   :  { %vm1871_vm14 = vmpackc.low %vm263_vm12, %vm262_vm13 }
  0x8d   :  { %1943 = vmatprep.mubr.msk.bf16.mxu0 %vm1871_vm14, %v2191_v59 }
  0x8e   :  { %v187_v2 = vpop.permute.xlu1 %186  ;;  %v180_v3 = vpop.permute.xlu0 %179 }
  0x8f   :  { %vm279_vm15 = vcmp.eq.s32.totalorder %v187_v2, %v2302_v56  ;;  %vm278_vm0 = vcmp.eq.s32.totalorder %v180_v3, %v2302_v56 }
  0x90   :  { %vm1887_vm1 = vmpackc.low %vm279_vm15, %vm278_vm0 }
  0x91   :  { %1959 = vmatprep.mubr.msk.bf16.mxu1 %vm1887_vm1, %v2191_v59 }
  0x92   :  { %v89_v4 = vpop.permute.xlu1 %88  ;;  %v82_v5 = vpop.permute.xlu0 %81 }
  0x93   :  { %vm265_vm2 = vcmp.eq.s32.totalorder %v89_v4, %v2302_v56  ;;  %vm264_vm3 = vcmp.eq.s32.totalorder %v82_v5, %v2302_v56 }
  0x94   :  { %vm1873_vm4 = vmpackc.low %vm265_vm2, %vm264_vm3 }
  0x95   :  { %1944 = vmatmul.mubr.msk.bf16.gmra.mxu0 %vm1873_vm4, %v2191_v59 }
  0x96   :  { %v201_v6 = vpop.permute.xlu1 %200  ;;  %v194_v7 = vpop.permute.xlu0 %193 }
  0x97   :  { %vm281_vm5 = vcmp.eq.s32.totalorder %v201_v6, %v2302_v56  ;;  %vm280_vm6 = vcmp.eq.s32.totalorder %v194_v7, %v2302_v56 }
  0x98   :  { %vm1889_vm7 = vmpackc.low %vm281_vm5, %vm280_vm6 }
  0x99   :  { %1960 = vmatmul.mubr.msk.bf16.gmra.mxu1 %vm1889_vm7, %v2191_v59 }
  0x9a   :  { %v103_v8 = vpop.permute.xlu1 %102  ;;  %v96_v9 = vpop.permute.xlu0 %95 }
  0x9b   :  { %vm267_vm8 = vcmp.eq.s32.totalorder %v103_v8, %v2302_v56  ;;  %vm266_vm9 = vcmp.eq.s32.totalorder %v96_v9, %v2302_v56 }
  0x9c   :  { %vm1875_vm10 = vmpackc.low %vm267_vm8, %vm266_vm9 }
  0x9d   :  { %1947 = vmatprep.mubr.msk.bf16.mxu0 %vm1875_vm10, %v2191_v59 }
  0x9e   :  { %v215_v10 = vpop.permute.xlu1 %214  ;;  %v208_v11 = vpop.permute.xlu0 %207 }
  0x9f   :  { %vm283_vm11 = vcmp.eq.s32.totalorder %v215_v10, %v2302_v56  ;;  %vm282_vm12 = vcmp.eq.s32.totalorder %v208_v11, %v2302_v56 }
  0xa0   :  { %vm1891_vm13 = vmpackc.low %vm283_vm11, %vm282_vm12 }
  0xa1   :  { %1963 = vmatprep.mubr.msk.bf16.mxu1 %vm1891_vm13, %v2191_v59 }
  0xa2   :  { %v117_v12 = vpop.permute.xlu1 %116  ;;  %v110_v13 = vpop.permute.xlu0 %109 }
  0xa3   :  { %vm269_vm14 = vcmp.eq.s32.totalorder %v117_v12, %v2302_v56  ;;  %vm268_vm15 = vcmp.eq.s32.totalorder %v110_v13, %v2302_v56 }
  0xa4   :  { %vm1877_vm0 = vmpackc.low %vm269_vm14, %vm268_vm15 }
  0xa5   :  { %1948 = vmatmul.mubr.msk.bf16.gmra.mxu0 %vm1877_vm0, %v2191_v59  ;;  %vm723_vm0 = vcmask 269568  }
  0xa6   :  { %v229_v14 = vpop.permute.xlu1 %228  ;;  %v222_v15 = vpop.permute.xlu0 %221 }
  0xa7   :  { %vm285_vm1 = vcmp.eq.s32.totalorder %v229_v14, %v2302_v56  ;;  %vm284_vm2 = vcmp.eq.s32.totalorder %v222_v15, %v2302_v56 }
  0xa8   :  { %vm1893_vm3 = vmpackc.low %vm285_vm1, %vm284_vm2  ;;  %vm1748_vm1 = vcmask 1041409   ;;  %vm1750_vm2 = vcmask 1042434  }
  0xa9   :  { %1964 = vmatmul.mubr.msk.bf16.gmra.mxu1 %vm1893_vm3, %v2191_v59  ;;  %vm1752_vm3 = vcmask 1043459  }
  0xaa   :  { %v131_v16 = vpop.permute.xlu1 %130  ;;  %v124_v17 = vpop.permute.xlu0 %123 }
  0xab   :  { %vm271_vm4 = vcmp.eq.s32.totalorder %v131_v16, %v2302_v56  ;;  %vm270_vm5 = vcmp.eq.s32.totalorder %v124_v17, %v2302_v56 }
  0xac   :  { %vm1879_vm6 = vmpackc.low %vm271_vm4, %vm270_vm5  ;;  %vm1754_vm4 = vcmask 1044484   ;;  %vm1756_vm5 = vcmask 1045509  }
  0xad   :  { %1951 = vmatprep.mubr.msk.bf16.mxu0 %vm1879_vm6, %v2191_v59  ;;  %vm1760_vm6 = vcmask 1047559  }
  0xae   :  { %v243_v18 = vpop.permute.xlu1 %242  ;;  %v236_v19 = vpop.permute.xlu0 %235 }
  0xaf   :  { %vm287_vm7 = vcmp.eq.s32.totalorder %v243_v18, %v2302_v56  ;;  %vm286_vm8 = vcmp.eq.s32.totalorder %v236_v19, %v2302_v56 }
  0xb0   :  { %vm1895_vm9 = vmpackc.low %vm287_vm7, %vm286_vm8  ;;  %vm1758_vm7 = vcmask 1046534  }
  0xb1   :  { %1967 = vmatprep.mubr.msk.bf16.mxu1 %vm1895_vm9, %v2191_v59 }
  0xb2   :  { %v145_v20 = vpop.permute.xlu1 %144  ;;  %v138_v21 = vpop.permute.xlu0 %137 }
  0xb3   :  { %vm273_vm10 = vcmp.eq.s32.totalorder %v145_v20, %v2302_v56  ;;  %vm272_vm11 = vcmp.eq.s32.totalorder %v138_v21, %v2302_v56 }
  0xb4   :  { %vm1881_vm12 = vmpackc.low %vm273_vm10, %vm272_vm11 }
  0xb5   :  { %1952 = vmatmul.mubr.msk.bf16.gmra.mxu0 %vm1881_vm12, %v2191_v59 }
  0xb6   :  { %v257_v22 = vpop.permute.xlu1 %256  ;;  %v250_v23 = vpop.permute.xlu0 %249 }
  0xb7   :  { %vm289_vm13 = vcmp.eq.s32.totalorder %v257_v22, %v2302_v56  ;;  %vm288_vm14 = vcmp.eq.s32.totalorder %v250_v23, %v2302_v56 }
  0xb8   :  { %vm1897_vm15 = vmpackc.low %vm289_vm13, %vm288_vm14 }
  0xb9   :  { %1968 = vmatmul.mubr.msk.bf16.gmra.mxu1 %vm1897_vm15, %v2191_v59 }
 0x145   :  { %v2352_v25 = vpop.f32.mrf.mxu0 }
 0x146   :  { %1999 = vtanh.f32 %v2352_v25 }
 0x147   :  { %v2355_v26 = vpop.f32.mrf.mxu0 }
 0x148   :  { %2001 = vtanh.f32 %v2355_v26 }
 0x149   :  { %v2358_v27 = vpop.f32.mrf.mxu0  ;;  %v2360_v28 = vpop.f32.mrf.mxu1 }
 0x14a   :  { %2907 = vst [vmem:[#allocation2_spill] sm:$0xff] %v2358_v27  ;;  %2003 = vtanh.f32 %v2358_v27 }
 0x14b   :  { %2005 = vtanh.f32 %v2360_v28  ;;  %v2364_v29 = vpop.f32.mrf.mxu0  ;;  %v2366_v30 = vpop.f32.mrf.mxu1 }
 0x14c   :  { %2908 = vst [vmem:[#allocation3_spill] sm:$0xff] %v2366_v30  ;;  %2007 = vtanh.f32 %v2364_v29 }
 0x14d   :  { %2009 = vtanh.f32 %v2366_v30  ;;  %v2370_v31 = vpop.f32.mrf.mxu1 }
 0x14e   :  { %2011 = vtanh.f32 %v2370_v31 }
 0x14f   :  { %v2373_v32 = vpop.f32.mrf.mxu1 }
 0x150   :  { %2909 = vst [vmem:[#allocation4_spill] sm:$0xff] %v2373_v32  ;;  %2013 = vtanh.f32 %v2373_v32 }
 0x153   :  { %v2000_v33 = vpop.eup %1999 }
 0x154   :  { %v738_v34 = vsel %vm723_vm0, %v2000_v33, -inf }
 0x155   :  { %v2377_v35 = vpop.eup %2001  ;;  %v739_v36 = vrot.slane %v738_v34, 4  ;;  %v2379_v37 = vpop.f32.mrf.mxu0 }
 0x156   :  { %2910 = vst [vmem:[#allocation5_spill] sm:$0xff] %v2379_v37  ;;  %v724_v38 = vsel %vm723_vm0, %v2377_v35, -inf  ;;  %2015 = vtanh.f32 %v2379_v37 }
 0x157   :  { %v2383_v39 = vpop.eup %2003  ;;  %v740_v40 = vmax.f32 %v738_v34, %v739_v36  ;;  %v725_v41 = vrot.slane %v724_v38, 4  ;;  %v2386_v42 = vpop.f32.mrf.mxu0 }
 0x158   :  { %2911 = vst [vmem:[#allocation6_spill] sm:$0xff] %v2386_v42  ;;  %v2388_v43 = vpop.eup %2005  ;;  %v745_v44 = vsel %vm723_vm0, %v2383_v39, -inf  ;;  %2017 = vtanh.f32 %v2386_v42 }
 0x159   :  { %v2393_v45 = vpop.eup %2007  ;;  %v741_v46 = vrot.slane %v740_v40, 2  ;;  %v726_v47 = vmax.f32 %v724_v38, %v725_v41  ;;  %v746_v48 = vrot.slane %v745_v44, 4  ;;  %v850_v49 = vsel %vm723_vm0, %v2388_v43, -inf  ;;  %v2397_v50 = vpop.f32.mrf.mxu0 }
 0x15a   :  { %2912 = vst [vmem:[#allocation7_spill] sm:$0xff] %v2397_v50  ;;  %v2399_v51 = vpop.f32.mrf.mxu1  ;;  %v2401_v52 = vpop.eup %2009  ;;  %v851_v53 = vrot.slane %v850_v49, 4  ;;  %v731_v54 = vsel %vm723_vm0, %v2393_v45, -inf  ;;  %2019 = vtanh.f32 %v2397_v50 }
 0x15b   :  { %2913 = vst [vmem:[#allocation8_spill] sm:$0xff] %v2399_v51  ;;  %v2406_v55 = vpop.eup %2011  ;;  %v742_v56 = vmax.f32 %v740_v40, %v741_v46  ;;  %v727_v57 = vrot.slane %v726_v47, 2  ;;  %v747_v58 = vmax.f32 %v745_v44, %v746_v48  ;;  %v732_v59 = vrot.slane %v731_v54, 4 }
 0x15c   :  { %v852_v60 = vmax.f32 %v850_v49, %v851_v53  ;;  %v836_v61 = vsel %vm723_vm0, %v2401_v52, -inf  ;;  %v857_v62 = vsel %vm723_vm0, %v2406_v55, -inf  ;;  %2021 = vtanh.f32 %v2399_v51 }
 0x15d   :  { %v2413_v63 = vpop.eup %2013  ;;  %v743_v0 = vrot.slane %v742_v56, 1  ;;  %v728_v1 = vmax.f32 %v726_v47, %v727_v57  ;;  %v748_v2 = vrot.slane %v747_v58, 2  ;;  %v733_v3 = vmax.f32 %v731_v54, %v732_v59 }
 0x15e   :  { %v853_v4 = vrot.slane %v852_v60, 2  ;;  %v837_v5 = vrot.slane %v836_v61, 4  ;;  %v858_v6 = vrot.slane %v857_v62, 4  ;;  %v843_v7 = vsel %vm723_vm0, %v2413_v63, -inf }
 0x15f   :  { %v744_v8 = vmax.f32 %v742_v56, %v743_v0  ;;  %v729_v9 = vrot.slane %v728_v1, 1  ;;  %v749_v10 = vmax.f32 %v747_v58, %v748_v2  ;;  %v734_v11 = vrot.slane %v733_v3, 2  ;;  %v2424_v58 = vpop.f32.mrf.mxu1  ;;  %v2431_v0 = vpop.f32.mrf.mxu0 }
 0x160   :  { %v854_v12 = vmax.f32 %v852_v60, %v853_v4  ;;  %v838_v13 = vmax.f32 %v836_v61, %v837_v5  ;;  %v859_v14 = vmax.f32 %v857_v62, %v858_v6  ;;  %v844_v15 = vrot.slane %v843_v7, 4  ;;  %2914 = vst [vmem:[#allocation9_spill] sm:$0xff] %v2424_v58  ;;  %2915 = vst [vmem:[#allocation10_spill] sm:$0xff] %v2431_v0 }
 0x161   :  { %v950_v16 = vsub.f32 %v2000_v33, %v744_v8  ;;  %v730_v17 = vmax.f32 %v728_v1, %v729_v9  ;;  %v750_v18 = vrot.slane %v749_v10, 1  ;;  %v735_v19 = vmax.f32 %v733_v3, %v734_v11 }
 0x162   :  { %v855_v20 = vrot.slane %v854_v12, 1  ;;  %v839_v21 = vrot.slane %v838_v13, 2  ;;  %v860_v22 = vrot.slane %v859_v14, 2  ;;  %v845_v23 = vmax.f32 %v843_v7, %v844_v15 }
 0x163   :  { %v984_v24 = vmul.f32 1.442695, %v950_v16  ;;  %v948_v34 = vsub.f32 %v2377_v35, %v730_v17  ;;  %v751_v36 = vmax.f32 %v749_v10, %v750_v18  ;;  %v736_v38 = vrot.slane %v735_v19, 1  ;;  %v2418_v40 = vpop.eup %2015  ;;  %v2441_v10 = vpop.f32.mrf.mxu1 }
 0x164   :  { %v856_v41 = vmax.f32 %v854_v12, %v855_v20  ;;  %v840_v44 = vmax.f32 %v838_v13, %v839_v21  ;;  %v861_v46 = vmax.f32 %v859_v14, %v860_v22  ;;  %v846_v47 = vrot.slane %v845_v23, 2  ;;  %2917 = vst [vmem:[#allocation12_spill] sm:$0xff] %v2441_v10 }
 0x165   :  { %v2420_v48 = vpop.eup %2017  ;;  %2023 = vpow2.f32 %v984_v24  ;;  %v980_v33 = vmul.f32 1.442695, %v948_v34  ;;  %v951_v49 = vsub.f32 %v2383_v39, %v751_v36  ;;  %v737_v53 = vmax.f32 %v735_v19, %v736_v38  ;;  %v2437_v7 = vpop.f32.mrf.mxu0 }
 0x166   :  { %v966_v54 = vsub.f32 %v2388_v43, %v856_v41  ;;  %v841_v56 = vrot.slane %v840_v44, 1  ;;  %v862_v57 = vrot.slane %v861_v46, 1  ;;  %v847_v35 = vmax.f32 %v845_v23, %v846_v47  ;;  %2916 = vst [vmem:[#allocation11_spill] sm:$0xff] %v2437_v7  ;;  %v2451_v23 = vpop.f32.mrf.mxu1 }
 0x167   :  { %v2426_v59 = vpop.eup %2019  ;;  %2025 = vpow2.f32 %v980_v33  ;;  %v986_v60 = vmul.f32 1.442695, %v951_v49  ;;  %v949_v61 = vsub.f32 %v2393_v45, %v737_v53  ;;  %v766_v62 = vsel %vm723_vm0, %v2418_v40, -inf  ;;  %2919 = vst [vmem:[#allocation14_spill] sm:$0xff] %v2451_v23 }
 0x168   :  { %v1016_v39 = vmul.f32 1.442695, %v966_v54  ;;  %v842_v1 = vmax.f32 %v840_v44, %v841_v56  ;;  %v863_v2 = vmax.f32 %v861_v46, %v862_v57  ;;  %v848_v43 = vrot.slane %v847_v35, 1 }
 0x169   :  { %v2433_v3 = vpop.eup %2021  ;;  %2027 = vpow2.f32 %v986_v60  ;;  %v982_v4 = vmul.f32 1.442695, %v949_v61  ;;  %v767_v5 = vrot.slane %v766_v62, 4  ;;  %v752_v6 = vsel %vm723_vm0, %v2420_v48, -inf  ;;  %v2453_v38 = vpop.f32.mrf.mxu1 }
 0x16a   :  { %2029 = vpow2.f32 %v1016_v39  ;;  %v964_v45 = vsub.f32 %v2401_v52, %v842_v1  ;;  %v967_v8 = vsub.f32 %v2406_v55, %v863_v2  ;;  %v849_v9 = vmax.f32 %v847_v35, %v848_v43  ;;  %v2449_v55 = vpop.f32.mrf.mxu0  ;;  %2920 = vst [vmem:[#allocation15_spill] sm:$0xff] %v2453_v38 }
 0x16b   :  { %2031 = vpow2.f32 %v982_v4  ;;  %v768_v11 = vmax.f32 %v766_v62, %v767_v5  ;;  %v753_v12 = vrot.slane %v752_v6, 4  ;;  %v773_v13 = vsel %vm723_vm0, %v2426_v59, -inf  ;;  %2918 = vst [vmem:[#allocation13_spill] sm:$0xff] %v2449_v55  ;;  %v2467_v61 = vpop.f32.mrf.mxu1 }
 0x16c   :  { %v1012_v14 = vmul.f32 1.442695, %v964_v45  ;;  %v1018_v15 = vmul.f32 1.442695, %v967_v8  ;;  %v965_v16 = vsub.f32 %v2413_v63, %v849_v9  ;;  %v774_v17 = vrot.slane %v773_v13, 4  ;;  %v2456_v46 = vpop.f32.mrf.mxu0  ;;  %2922 = vst [vmem:[#allocation17_spill] sm:$0xff] %v2467_v61 }
 0x16d   :  { %v769_v18 = vrot.slane %v768_v11, 2  ;;  %v754_v19 = vmax.f32 %v752_v6, %v753_v12  ;;  %v878_v52 = vsel %vm723_vm0, %v2433_v3, -inf  ;;  %2033 = vtanh.f32 %v2431_v0  ;;  %2921 = vst [vmem:[#allocation16_spill] sm:$0xff] %v2456_v46 }
 0x16e   :  { %2035 = vpow2.f32 %v1012_v14  ;;  %v1014_v20 = vmul.f32 1.442695, %v965_v16  ;;  %v775_v21 = vmax.f32 %v773_v13, %v774_v17  ;;  %v879_v22 = vrot.slane %v878_v52, 4  ;;  %v2471_v2 = vpop.f32.mrf.mxu0 }
 0x16f   :  { %2037 = vpow2.f32 %v1018_v15  ;;  %v770_v24 = vmax.f32 %v768_v11, %v769_v18  ;;  %v755_v34 = vrot.slane %v754_v19, 2  ;;  %2923 = vst [vmem:[#allocation18_spill] sm:$0xff] %v2471_v2  ;;  %v2486_v15 = vpop.f32.mrf.mxu1 }
 0x170   :  { %2039 = vpow2.f32 %v1014_v20  ;;  %v776_v63 = vrot.slane %v775_v21, 2  ;;  %v880_v36 = vmax.f32 %v878_v52, %v879_v22  ;;  %2924 = vst [vmem:[#allocation19_spill] sm:$0xff] %v2486_v15 }
 0x171   :  { %v771_v41 = vrot.slane %v770_v24, 1  ;;  %v756_v44 = vmax.f32 %v754_v19, %v755_v34  ;;  %2041 = vtanh.f32 %v2424_v58 }
 0x172   :  { %v2458_v47 = vpop.eup %2023  ;;  %v777_v33 = vmax.f32 %v775_v21, %v776_v63  ;;  %v881_v49 = vrot.slane %v880_v36, 2  ;;  %2043 = vtanh.f32 %v2441_v10 }
 0x173   :  { %v772_v53 = vmax.f32 %v770_v24, %v771_v41  ;;  %v757_v54 = vrot.slane %v756_v44, 1  ;;  %2045 = vtanh.f32 %v2451_v23  ;;  %v1058_v56 = vsel %vm723_vm0, %v2458_v47, 0.0 }
 0x174   :  { %v2464_v57 = vpop.eup %2025  ;;  %v778_v35 = vrot.slane %v777_v33, 1  ;;  %v882_v60 = vmax.f32 %v880_v36, %v881_v49  ;;  %2047 = vtanh.f32 %v2437_v7  ;;  %v1059_v62 = vrot.slane %v1058_v56, 4 }
 0x175   :  { %v954_v39 = vsub.f32 %v2418_v40, %v772_v53  ;;  %v758_v1 = vmax.f32 %v756_v44, %v757_v54  ;;  %2049 = vtanh.f32 %v2449_v55  ;;  %v1044_v43 = vsel %vm723_vm0, %v2464_v57, 0.0  ;;  %v2488_v16 = vpop.f32.mrf.mxu0 }
 0x176   :  { %v2475_v4 = vpop.eup %2027  ;;  %v779_v5 = vmax.f32 %v777_v33, %v778_v35  ;;  %v883_v6 = vrot.slane %v882_v60, 1  ;;  %2051 = vtanh.f32 %v2456_v46  ;;  %v1060_v45 = vadd.f32 %v1059_v62, %v1058_v56  ;;  %2925 = vst [vmem:[#allocation20_spill] sm:$0xff] %v2488_v16  ;;  %v2502_v33 = vpop.f32.mrf.mxu1 }
 0x177   :  { %v2478_v8 = vpop.eup %2029  ;;  %v992_v9 = vmul.f32 1.442695, %v954_v39  ;;  %v952_v40 = vsub.f32 %v2420_v48, %v758_v1  ;;  %2053 = vtanh.f32 %v2453_v38  ;;  %v1045_v11 = vrot.slane %v1044_v43, 4  ;;  %2926 = vst [vmem:[#allocation21_spill] sm:$0xff] %v2502_v33  ;;  %v2504_v49 = vpop.f32.mrf.mxu0 }
 0x178   :  { %v2482_v12 = vpop.eup %2031  ;;  %v955_v13 = vsub.f32 %v2426_v59, %v779_v5  ;;  %v884_v14 = vmax.f32 %v882_v60, %v883_v6  ;;  %2055 = vtanh.f32 %v2471_v2  ;;  %v1061_v17 = vrot.slane %v1060_v45, 2  ;;  %2927 = vst [vmem:[#allocation22_spill] sm:$0xff] %v2504_v49 }
 0x179   :  { %2057 = vpow2.f32 %v992_v9  ;;  %v988_v18 = vmul.f32 1.442695, %v952_v40  ;;  %v1170_v48 = vsel %vm723_vm0, %v2478_v8, 0.0  ;;  %v1046_v19 = vadd.f32 %v1045_v11, %v1044_v43 }
 0x17a   :  { %v2492_v52 = vpop.eup %2033  ;;  %v994_v20 = vmul.f32 1.442695, %v955_v13  ;;  %v970_v21 = vsub.f32 %v2433_v3, %v884_v14  ;;  %2059 = vtanh.f32 %v2467_v61  ;;  %v1062_v59 = vadd.f32 %v1061_v17, %v1060_v45  ;;  %v2531_v14 = vpop.f32.mrf.mxu0 }
 0x17b   :  { %v2496_v22 = vpop.eup %2035  ;;  %2061 = vpow2.f32 %v988_v18  ;;  %v759_v24 = vsel %vm723_vm0, %v2492_v52, -inf  ;;  %v1171_v34 = vrot.slane %v1170_v48, 4  ;;  %v1047_v63 = vrot.slane %v1046_v19, 2  ;;  %2928 = vst [vmem:[#allocation23_spill] sm:$0xff] %v2531_v14 }
 0x17c   :  { %v2500_v36 = vpop.eup %2037  ;;  %2063 = vpow2.f32 %v994_v20  ;;  %v1024_v41 = vmul.f32 1.442695, %v970_v21  ;;  %v760_v44 = vrot.slane %v759_v24, 4  ;;  %v1063_v3 = vrot.slane %v1062_v59, 1 }
 0x17d   :  { %v2506_v53 = vpop.eup %2039  ;;  %2065 = vtanh.f32 %v2486_v15  ;;  %v1172_v54 = vadd.f32 %v1171_v34, %v1170_v48  ;;  %v2509_v56 = vadd.f32 %v1047_v63, %v1046_v19  ;;  %v2513_v35 = vsel %vm723_vm0, %v2500_v36, 0.0 }
 0x17e   :  { %v2515_v60 = vpop.eup %2041  ;;  %2067 = vpow2.f32 %v1024_v41  ;;  %v761_v62 = vmax.f32 %v759_v24, %v760_v44  ;;  %v2517_v39 = vadd.f32 %v1063_v3, %v1062_v59 }
 0x17f   :  { %v2520_v43 = vpop.eup %2043  ;;  %v864_v5 = vsel %vm723_vm0, %v2515_v60, -inf  ;;  %2069 = vtanh.f32 %v2502_v33  ;;  %v1173_v6 = vrot.slane %v1172_v54, 2 }
 0x180   :  { %v2526_v9 = vpop.eup %2045  ;;  %v762_v40 = vrot.slane %v761_v62, 2  ;;  %v865_v11 = vrot.slane %v864_v5, 4  ;;  %v885_v13 = vsel %vm723_vm0, %v2520_v43, -inf  ;;  %2071 = vtanh.f32 %v2488_v16 }
 0x181   :  { %v2533_v17 = vpop.eup %2047  ;;  %v886_v18 = vrot.slane %v885_v13, 4  ;;  %v871_v48 = vsel %vm723_vm0, %v2526_v9, -inf  ;;  %2073 = vtanh.f32 %v2504_v49  ;;  %v2538_v19 = vadd.f32 %v1173_v6, %v1172_v54 }
 0x182   :  { %v2540_v20 = vpop.eup %2049  ;;  %v763_v21 = vmax.f32 %v761_v62, %v762_v40  ;;  %v866_v59 = vmax.f32 %v864_v5, %v865_v11  ;;  %v872_v24 = vrot.slane %v871_v48, 4  ;;  %v794_v34 = vsel %vm723_vm0, %v2533_v17, -inf }
 0x183   :  { %v2544_v63 = vpop.eup %2051  ;;  %v887_v41 = vmax.f32 %v885_v13, %v886_v18  ;;  %v795_v44 = vrot.slane %v794_v34, 4  ;;  %v780_v3 = vsel %vm723_vm0, %v2540_v20, -inf  ;;  %2075 = vtanh.f32 %v2531_v14 }
 0x184   :  { %v2549_v1 = vpop.eup %2053  ;;  %v764_v54 = vrot.slane %v763_v21, 1  ;;  %v867_v6 = vrot.slane %v866_v59, 2  ;;  %v873_v45 = vmax.f32 %v871_v48, %v872_v24  ;;  %v781_v62 = vrot.slane %v780_v3, 4 }
 0x185   :  { %v2551_v5 = vpop.eup %2055  ;;  %v888_v40 = vrot.slane %v887_v41, 2  ;;  %v796_v11 = vmax.f32 %v794_v34, %v795_v44  ;;  %v801_v10 = vsel %vm723_vm0, %v2544_v63, -inf  ;;  %v906_v13 = vsel %vm723_vm0, %v2549_v1, -inf }
 0x186   :  { %v2557_v18 = vpop.eup %2057  ;;  %v765_v49 = vmax.f32 %v763_v21, %v764_v54  ;;  %v868_v14 = vmax.f32 %v866_v59, %v867_v6  ;;  %v874_v2 = vrot.slane %v873_v45, 2  ;;  %v782_v16 = vmax.f32 %v780_v3, %v781_v62 }
 0x187   :  { %v2559_v15 = vpop.eup %2059  ;;  %v889_v48 = vmax.f32 %v887_v41, %v888_v40  ;;  %v797_v24 = vrot.slane %v796_v11, 2  ;;  %v802_v33 = vrot.slane %v801_v10, 4  ;;  %v907_v55 = vrot.slane %v906_v13, 4 }
 0x188   :  { %v2561_v46 = vpop.eup %2061  ;;  %v953_v34 = vsub.f32 %v2492_v52, %v765_v49  ;;  %v869_v44 = vrot.slane %v868_v14, 1  ;;  %v875_v23 = vmax.f32 %v873_v45, %v874_v2  ;;  %v783_v38 = vrot.slane %v782_v16, 2 }
 0x189   :  { %v2564_v61 = vpop.eup %2063  ;;  %v890_v7 = vrot.slane %v889_v48, 1  ;;  %v798_v21 = vmax.f32 %v796_v11, %v797_v24  ;;  %v803_v59 = vmax.f32 %v801_v10, %v802_v33  ;;  %v908_v54 = vmax.f32 %v906_v13, %v907_v55 }
 0x18a   :  { %v2566_v3 = vpop.eup %2065  ;;  %v990_v6 = vmul.f32 1.442695, %v953_v34  ;;  %v870_v41 = vmax.f32 %v868_v14, %v869_v44  ;;  %v876_v62 = vrot.slane %v875_v23, 1  ;;  %v784_v40 = vmax.f32 %v782_v16, %v783_v38 }
 0x18b   :  { %v2568_v0 = vpop.eup %2067  ;;  %v891_v58 = vmax.f32 %v889_v48, %v890_v7  ;;  %v799_v50 = vrot.slane %v798_v21, 1  ;;  %v804_v52 = vrot.slane %v803_v59, 2  ;;  %v909_v49 = vrot.slane %v908_v54, 2 }
 0x18c   :  { %v2570_v2 = vpop.eup %2069  ;;  %2077 = vpow2.f32 %v990_v6  ;;  %v968_v45 = vsub.f32 %v2515_v60, %v870_v41  ;;  %v877_v11 = vmax.f32 %v875_v23, %v876_v62  ;;  %v785_v10 = vrot.slane %v784_v40, 1 }
 0x18d   :  { %v2573_v55 = vpop.eup %2071  ;;  %v971_v33 = vsub.f32 %v2520_v43, %v891_v58  ;;  %v800_v14 = vmax.f32 %v798_v21, %v799_v50  ;;  %v805_v13 = vmax.f32 %v803_v59, %v804_v52  ;;  %v910_v38 = vmax.f32 %v908_v54, %v909_v49 }
 0x18e   :  { %v2576_v16 = vpop.eup %2073  ;;  %v1020_v7 = vmul.f32 1.442695, %v968_v45  ;;  %v969_v48 = vsub.f32 %v2526_v9, %v877_v11  ;;  %v786_v24 = vmax.f32 %v784_v40, %v785_v10  ;;  %v787_v34 = vsel %vm723_vm0, %v2551_v5, -inf  ;;  %v2589_v45 = vpop.f32.mrf.mxu1 }
 0x18f   :  { %v1026_v44 = vmul.f32 1.442695, %v971_v33  ;;  %v958_v23 = vsub.f32 %v2533_v17, %v800_v14  ;;  %v806_v60 = vrot.slane %v805_v13, 1  ;;  %v911_v6 = vrot.slane %v910_v38, 1  ;;  %2929 = vst [vmem:[#allocation24_spill] sm:$0xff] %v2589_v45 }
 0x190   :  { %v2582_v41 = vpop.eup %2075  ;;  %2079 = vpow2.f32 %v1020_v7  ;;  %v1022_v50 = vmul.f32 1.442695, %v969_v48  ;;  %v956_v58 = vsub.f32 %v2540_v20, %v786_v24  ;;  %v788_v43 = vrot.slane %v787_v34, 4 }
 0x191   :  { %2081 = vpow2.f32 %v1026_v44  ;;  %v1000_v21 = vmul.f32 1.442695, %v958_v23  ;;  %v807_v59 = vmax.f32 %v805_v13, %v806_v60  ;;  %v912_v9 = vmax.f32 %v910_v38, %v911_v6  ;;  %v2599_v23 = vpop.f32.mrf.mxu1 }
 0x192   :  { %2083 = vpow2.f32 %v1022_v50  ;;  %v996_v54 = vmul.f32 1.442695, %v956_v58  ;;  %v789_v62 = vmax.f32 %v787_v34, %v788_v43  ;;  %v892_v40 = vsel %vm723_vm0, %v2559_v15, -inf  ;;  %2930 = vst [vmem:[#allocation25_spill] sm:$0xff] %v2599_v23 }
 0x193   :  { %2085 = vpow2.f32 %v1000_v21  ;;  %v959_v17 = vsub.f32 %v2544_v63, %v807_v59  ;;  %v974_v52 = vsub.f32 %v2549_v1, %v912_v9  ;;  %v893_v49 = vrot.slane %v892_v40, 4 }
 0x194   :  { %2087 = vpow2.f32 %v996_v54  ;;  %v790_v20 = vrot.slane %v789_v62, 2  ;;  %v913_v11 = vsel %vm723_vm0, %v2566_v3, -inf  ;;  %v899_v10 = vsel %vm723_vm0, %v2570_v2, -inf }
 0x195   :  { %v1002_v33 = vmul.f32 1.442695, %v959_v17  ;;  %v1032_v14 = vmul.f32 1.442695, %v974_v52  ;;  %v894_v13 = vmax.f32 %v892_v40, %v893_v49  ;;  %v914_v38 = vrot.slane %v913_v11, 4  ;;  %v2605_v52 = vpop.f32.mrf.mxu0 }
 0x196   :  { %v791_v7 = vmax.f32 %v789_v62, %v790_v20  ;;  %v900_v48 = vrot.slane %v899_v10, 4  ;;  %v822_v1 = vsel %vm723_vm0, %v2573_v55, -inf  ;;  %v808_v63 = vsel %vm723_vm0, %v2576_v16, -inf  ;;  %2931 = vst [vmem:[#allocation26_spill] sm:$0xff] %v2605_v52 }
 0x197   :  { %2089 = vpow2.f32 %v1002_v33  ;;  %v895_v24 = vrot.slane %v894_v13, 2  ;;  %v915_v34 = vmax.f32 %v913_v11, %v914_v38  ;;  %v823_v44 = vrot.slane %v822_v1, 4 }
 0x198   :  { %2091 = vpow2.f32 %v1032_v14  ;;  %v792_v60 = vrot.slane %v791_v7, 1  ;;  %v901_v6 = vmax.f32 %v899_v10, %v900_v48  ;;  %v809_v50 = vrot.slane %v808_v63, 4  ;;  %v2608_v10 = vpop.f32.mrf.mxu1 }
 0x199   :  { %v2601_v58 = vpop.eup %2077  ;;  %v896_v43 = vmax.f32 %v894_v13, %v895_v24  ;;  %v916_v21 = vrot.slane %v915_v34, 2  ;;  %v824_v59 = vmax.f32 %v822_v1, %v823_v44  ;;  %v829_v9 = vsel %vm723_vm0, %v2582_v41, -inf  ;;  %2932 = vst [vmem:[#allocation27_spill] sm:$0xff] %v2608_v10 }
 0x19a   :  { %v793_v54 = vmax.f32 %v791_v7, %v792_v60  ;;  %v902_v62 = vrot.slane %v901_v6, 2  ;;  %v810_v40 = vmax.f32 %v808_v63, %v809_v50  ;;  %v830_v17 = vrot.slane %v829_v9, 4 }
 0x19b   :  { %v897_v49 = vrot.slane %v896_v43, 1  ;;  %v917_v20 = vmax.f32 %v915_v34, %v916_v21  ;;  %v825_v11 = vrot.slane %v824_v59, 2  ;;  %2093 = vtanh.f32 %v2589_v45 }
 0x19c   :  { %v957_v33 = vsub.f32 %v2551_v5, %v793_v54  ;;  %v903_v14 = vmax.f32 %v901_v6, %v902_v62  ;;  %v811_v13 = vrot.slane %v810_v40, 2  ;;  %v831_v38 = vmax.f32 %v829_v9, %v830_v17  ;;  %v2620_v9 = vpop.f32.mrf.mxu1 }
 0x19d   :  { %v2611_v48 = vpop.eup %2079  ;;  %v898_v7 = vmax.f32 %v896_v43, %v897_v49  ;;  %v918_v1 = vrot.slane %v917_v20, 1  ;;  %v826_v63 = vmax.f32 %v824_v59, %v825_v11  ;;  %2095 = vtanh.f32 %v2605_v52  ;;  %2933 = vst [vmem:[#allocation28_spill] sm:$0xff] %v2620_v9 }
 0x19e   :  { %v2614_v24 = vpop.eup %2081  ;;  %v998_v34 = vmul.f32 1.442695, %v957_v33  ;;  %v904_v44 = vrot.slane %v903_v14, 1  ;;  %v812_v60 = vmax.f32 %v810_v40, %v811_v13  ;;  %v832_v50 = vrot.slane %v831_v38, 2 }
 0x19f   :  { %v2616_v21 = vpop.eup %2083  ;;  %v972_v5 = vsub.f32 %v2559_v15, %v898_v7  ;;  %v919_v6 = vmax.f32 %v917_v20, %v918_v1  ;;  %v827_v54 = vrot.slane %v826_v63, 1  ;;  %2097 = vtanh.f32 %v2599_v23 }
 0x1a0   :  { %v2622_v43 = vpop.eup %2085  ;;  %2099 = vpow2.f32 %v998_v34  ;;  %v905_v59 = vmax.f32 %v903_v14, %v904_v44  ;;  %v813_v62 = vrot.slane %v812_v60, 1  ;;  %v833_v17 = vmax.f32 %v831_v38, %v832_v50 }
 0x1a1   :  { %v2624_v49 = vpop.eup %2087  ;;  %v1028_v40 = vmul.f32 1.442695, %v972_v5  ;;  %v975_v11 = vsub.f32 %v2566_v3, %v919_v6  ;;  %v828_v33 = vmax.f32 %v826_v63, %v827_v54  ;;  %2101 = vtanh.f32 %v2608_v10 }
 0x1a2   :  { %v973_v15 = vsub.f32 %v2570_v2, %v905_v59  ;;  %v814_v20 = vmax.f32 %v812_v60, %v813_v62  ;;  %v834_v13 = vrot.slane %v833_v17, 1  ;;  %2103 = vtanh.f32 %v2620_v9 }
 0x1a3   :  { %2105 = vpow2.f32 %v1028_v40  ;;  %v1034_v7 = vmul.f32 1.442695, %v975_v11  ;;  %v962_v14 = vsub.f32 %v2573_v55, %v828_v33  ;;  %v1175_v38 = vrot.slane %v2538_v19, 1 }
 0x1a4   :  { %v2632_v1 = vpop.eup %2089  ;;  %v1030_v34 = vmul.f32 1.442695, %v973_v15  ;;  %v960_v3 = vsub.f32 %v2576_v16, %v814_v20  ;;  %v835_v63 = vmax.f32 %v833_v17, %v834_v13  ;;  %2107 = vrcp.f32 %v2517_v39 }
 0x1a5   :  { %v2636_v44 = vpop.eup %2091  ;;  %2109 = vpow2.f32 %v1034_v7  ;;  %v1008_v2 = vmul.f32 1.442695, %v962_v14  ;;  %v1176_v60 = vadd.f32 %v1175_v38, %v2538_v19  ;;  %v2934_v50 = vrot.slane %v2509_v56, 1 }
 0x1a6   :  { %2111 = vpow2.f32 %v1030_v34  ;;  %v1004_v5 = vmul.f32 1.442695, %v960_v3  ;;  %v963_v6 = vsub.f32 %v2582_v41, %v835_v63  ;;  %v2935_v16 = vrot.slane %v2513_v35, 4 }
 0x1a7   :  { %v1050_v55 = vadd.f32 %v2934_v50, %v2509_v56  ;;  %2113 = vpow2.f32 %v1008_v2  ;;  %v1156_v39 = vsel %vm723_vm0, %v2496_v22, 0.0  ;;  %v1051_v59 = vsel %vm723_vm0, %v2482_v12, 0.0 }
 0x1a8   :  { %v1179_v54 = vadd.f32 %v2935_v16, %v2513_v35  ;;  %v1065_v19 = vsel %vm723_vm0, %v2475_v4, 0.0  ;;  %v2652_v62 = vpop.eup %2093  ;;  %2115 = vpow2.f32 %v1004_v5  ;;  %v1010_v56 = vmul.f32 1.442695, %v963_v6 }
 0x1a9   :  { %v1157_v41 = vrot.slane %v1156_v39, 4  ;;  %v934_v40 = vsel %vm723_vm0, %v2652_v62, -inf  ;;  %2117 = vrcp.f32 %v1176_v60  ;;  %v1052_v35 = vrot.slane %v1051_v59, 4 }
 0x1aa   :  { %v1180_v17 = vrot.slane %v1179_v54, 2  ;;  %v1066_v11 = vrot.slane %v1065_v19, 4  ;;  %v2656_v33 = vpop.eup %2095  ;;  %2119 = vpow2.f32 %v1010_v56  ;;  %v935_v15 = vrot.slane %v934_v40, 4 }
 0x1ab   :  { %v1158_v13 = vadd.f32 %v1157_v41, %v1156_v39  ;;  %v815_v7 = vsel %vm723_vm0, %v2656_v33, -inf  ;;  %2121 = vrcp.f32 %v1050_v55  ;;  %v1053_v14 = vadd.f32 %v1052_v35, %v1051_v59 }
 0x1ac   :  { %v1181_v20 = vadd.f32 %v1180_v17, %v1179_v54  ;;  %v1067_v38 = vadd.f32 %v1066_v11, %v1065_v19  ;;  %v2660_v34 = vpop.eup %2097  ;;  %v936_v3 = vmax.f32 %v934_v40, %v935_v15  ;;  %v816_v63 = vrot.slane %v815_v7, 4 }
 0x1ad   :  { %v1159_v60 = vrot.slane %v1158_v13, 2  ;;  %v2662_v50 = vpop.eup %2099  ;;  %v920_v5 = vsel %vm723_vm0, %v2660_v34, -inf  ;;  %v1054_v6 = vrot.slane %v1053_v14, 2  ;;  %v1163_v54 = vsel %vm723_vm0, %v2506_v53, 0.0 }
 0x1ae   :  { %v1182_v2 = vrot.slane %v1181_v20, 1  ;;  %v1068_v16 = vrot.slane %v1067_v38, 2  ;;  %v2668_v39 = vpop.eup %2101  ;;  %v937_v55 = vrot.slane %v936_v3, 2  ;;  %v817_v59 = vmax.f32 %v815_v7, %v816_v63 }
 0x1af   :  { %v921_v19 = vrot.slane %v920_v5, 4  ;;  %v2670_v17 = vpop.eup %2103  ;;  %v941_v41 = vsel %vm723_vm0, %v2668_v39, -inf  ;;  %v1160_v40 = vadd.f32 %v1159_v60, %v1158_v13  ;;  %v1055_v35 = vadd.f32 %v1054_v6, %v1053_v14 }
 0x1b0   :  { %v1183_v56 = vadd.f32 %v1182_v2, %v1181_v20  ;;  %v1069_v11 = vadd.f32 %v1068_v16, %v1067_v38  ;;  %v2674_v15 = vpop.eup %2105  ;;  %v938_v10 = vmax.f32 %v936_v3, %v937_v55  ;;  %v818_v9 = vrot.slane %v817_v59, 2 }
 0x1b1   :  { %v922_v23 = vmax.f32 %v920_v5, %v921_v19  ;;  %v942_v52 = vrot.slane %v941_v41, 4  ;;  %v2108_v45 = vpop.eup %2107  ;;  %v927_v7 = vsel %vm723_vm0, %v2670_v17, -inf  ;;  %v1161_v20 = vrot.slane %v1160_v40, 1 }
 0x1b2   :  { %2123 = vrcp.f32 %v1183_v56  ;;  %v1056_v63 = vrot.slane %v1055_v35, 1  ;;  %v2678_v2 = vpop.eup %2109  ;;  %v939_v51 = vrot.slane %v938_v10, 1  ;;  %v819_v42 = vmax.f32 %v817_v59, %v818_v9 }
 0x1b3   :  { %v923_v13 = vrot.slane %v922_v23, 2  ;;  %v943_v14 = vmax.f32 %v941_v41, %v942_v52  ;;  %v2680_v38 = vpop.eup %2111  ;;  %v928_v60 = vrot.slane %v927_v7, 4  ;;  %v1273_v3 = vmul.f32 %v2108_v45, %v2458_v47 }
 0x1b4   :  { %v1162_v5 = vadd.f32 %v1161_v20, %v1160_v40  ;;  %v1057_v6 = vadd.f32 %v1056_v63, %v1055_v35  ;;  %v2683_v16 = vpop.eup %2113  ;;  %v940_v55 = vmax.f32 %v938_v10, %v939_v51  ;;  %v820_v19 = vrot.slane %v819_v42, 1 }
 0x1b5   :  { %v924_v56 = vmax.f32 %v922_v23, %v923_v13  ;;  %v944_v37 = vrot.slane %v943_v14, 2  ;;  %v2685_v32 = vpop.eup %2115  ;;  %v929_v27 = vmax.f32 %v927_v7, %v928_v60  ;;  %1344 = vperm.xlu1 %1989, %v1273_v3   ;;  %v1070_v9 = vrot.slane %v1069_v11, 1 }
 0x1b6   :  { %2125 = vrcp.f32 %v1162_v5  ;;  %v1164_v52 = vrot.slane %v1163_v54, 4  ;;  %v2118_v59 = vpop.eup %2117  ;;  %v978_v41 = vsub.f32 %v2652_v62, %v940_v55  ;;  %v821_v30 = vmax.f32 %v819_v42, %v820_v19 }
 0x1b7   :  { %v925_v47 = vrot.slane %v924_v56, 1  ;;  %v945_v45 = vmax.f32 %v943_v14, %v944_v37  ;;  %v2688_v40 = vpop.eup %2119  ;;  %v930_v35 = vrot.slane %v929_v27, 2  ;;  %v1305_v51 = vmul.f32 %v2118_v59, %v2478_v8 }
 0x1b8   :  { %2127 = vrcp.f32 %v1057_v6  ;;  %v1071_v23 = vadd.f32 %v1070_v9, %v1069_v11  ;;  %v2122_v10 = vpop.eup %2121  ;;  %v1040_v20 = vmul.f32 1.442695, %v978_v41  ;;  %v961_v7 = vsub.f32 %v2656_v33, %v821_v30 }
 0x1b9   :  { %v926_v63 = vmax.f32 %v924_v56, %v925_v47  ;;  %v946_v13 = vrot.slane %v945_v45, 1  ;;  %v931_v60 = vmax.f32 %v929_v27, %v930_v35  ;;  %1424 = vperm.xlu0 %1990, %v1305_v51   ;;  %v1269_v62 = vmul.f32 %v2122_v10, %v2464_v57 }
 0x1ba   :  { %2129 = vrcp.f32 %v1071_v23  ;;  %v1165_v42 = vadd.f32 %v1164_v52, %v1163_v54  ;;  %v1006_v37 = vmul.f32 1.442695, %v961_v7  ;;  %v1086_v11 = vsel %vm723_vm0, %v2557_v18, 0.0 }
 0x1bb   :  { %2131 = vpow2.f32 %v1040_v20  ;;  %v976_v14 = vsub.f32 %v2660_v34, %v926_v63  ;;  %v947_v3 = vmax.f32 %v945_v45, %v946_v13  ;;  %v932_v8 = vrot.slane %v931_v60, 1 }
 0x1bc   :  { %v1166_v5 = vrot.slane %v1165_v42, 2  ;;  %v1198_v30 = vsel %vm723_vm0, %v2568_v0, 0.0  ;;  %2133 = vpow2.f32 %v1006_v37  ;;  %v1087_v57 = vrot.slane %v1086_v11, 4 }
 0x1bd   :  { %v1036_v27 = vmul.f32 1.442695, %v976_v14  ;;  %v979_v33 = vsub.f32 %v2668_v39, %v947_v3  ;;  %v933_v6 = vmax.f32 %v931_v60, %v932_v8  ;;  %1334 = vperm.xlu0 %1990, %v1269_v62   ;;  %v1199_v55 = vrot.slane %v1198_v30, 4 }
 0x1be   :  { %v1167_v54 = vadd.f32 %v1166_v5, %v1165_v42  ;;  %v1072_v34 = vsel %vm723_vm0, %v2561_v46, 0.0  ;;  %v1088_v9 = vadd.f32 %v1087_v57, %v1086_v11  ;;  %v1184_v51 = vsel %vm723_vm0, %v2611_v48, 0.0 }
 0x1bf   :  { %v2124_v19 = vpop.eup %2123  ;;  %2135 = vpow2.f32 %v1036_v27  ;;  %v1042_v56 = vmul.f32 1.442695, %v979_v33  ;;  %v1073_v52 = vrot.slane %v1072_v34, 4  ;;  %v977_v59 = vsub.f32 %v2670_v17, %v933_v6 }
 0x1c0   :  { %v1307_v41 = vmul.f32 %v2124_v19, %v2500_v36  ;;  %v1168_v47 = vrot.slane %v1167_v54, 1  ;;  %v1200_v45 = vadd.f32 %v1199_v55, %v1198_v30  ;;  %v1089_v39 = vrot.slane %v1088_v9, 2 }
 0x1c1   :  { %2137 = vpow2.f32 %v1042_v56  ;;  %v1074_v35 = vadd.f32 %v1073_v52, %v1072_v34  ;;  %v1038_v23 = vmul.f32 1.442695, %v977_v59  ;;  %v1185_v7 = vrot.slane %v1184_v51, 4 }
 0x1c2   :  { %1429 = vperm.xlu1 %1989, %v1307_v41   ;;  %v1169_v10 = vadd.f32 %v1168_v47, %v1167_v54  ;;  %v1201_v20 = vrot.slane %v1200_v45, 2  ;;  %v1090_v13 = vadd.f32 %v1089_v39, %v1088_v9  ;;  %v1093_v17 = vsel %vm723_vm0, %v2564_v61, 0.0 }
 0x1c3   :  { %v2126_v63 = vpop.eup %2125  ;;  %v1075_v60 = vrot.slane %v1074_v35, 2  ;;  %v1191_v36 = vsel %vm723_vm0, %v2616_v21, 0.0  ;;  %2139 = vpow2.f32 %v1038_v23  ;;  %v1186_v37 = vadd.f32 %v1185_v7, %v1184_v51 }
 0x1c4   :  { %v1301_v62 = vmul.f32 %v2126_v63, %v2496_v22  ;;  %v1202_v42 = vadd.f32 %v1201_v20, %v1200_v45  ;;  %2141 = vrcp.f32 %v1169_v10  ;;  %v1091_v3 = vrot.slane %v1090_v13, 1 }
 0x1c5   :  { %v2128_v14 = vpop.eup %2127  ;;  %v1076_v8 = vadd.f32 %v1075_v60, %v1074_v35  ;;  %v1094_v5 = vrot.slane %v1093_v17, 4  ;;  %v1187_v27 = vrot.slane %v1186_v37, 2  ;;  %v1192_v33 = vrot.slane %v1191_v36, 4 }
 0x1c6   :  { %1414 = vperm.xlu0 %1990, %v1301_v62   ;;  %v1271_v11 = vmul.f32 %v2128_v14, %v2482_v12  ;;  %v1203_v30 = vrot.slane %v1202_v42, 1  ;;  %v1092_v6 = vadd.f32 %v1091_v3, %v1090_v13  ;;  %v1079_v22 = vsel %vm723_vm0, %v2601_v58, 0.0 }
 0x1c7   :  { %v2130_v57 = vpop.eup %2129  ;;  %v1077_v54 = vrot.slane %v1076_v8, 1  ;;  %v1095_v55 = vadd.f32 %v1094_v5, %v1093_v17  ;;  %v1188_v9 = vadd.f32 %v1187_v27, %v1186_v37  ;;  %v1193_v52 = vadd.f32 %v1192_v33, %v1191_v36 }
 0x1c8   :  { %v2713_v34 = vpop.eup %2131  ;;  %1339 = vperm.xlu1 %1989, %v1271_v11   ;;  %v1275_v19 = vmul.f32 %v2130_v57, %v2475_v4  ;;  %v1204_v56 = vadd.f32 %v1203_v30, %v1202_v42  ;;  %2143 = vrcp.f32 %v1092_v6  ;;  %v1080_v41 = vrot.slane %v1079_v22, 4 }
 0x1c9   :  { %v1078_v12 = vadd.f32 %v1077_v54, %v1076_v8  ;;  %v1096_v59 = vrot.slane %v1095_v55, 2  ;;  %v2716_v47 = vpop.eup %2133  ;;  %v1189_v45 = vrot.slane %v1188_v9, 1  ;;  %v1194_v39 = vrot.slane %v1193_v52, 2 }
 0x1ca   :  { %1349 = vperm.xlu0 %1990, %v1275_v19   ;;  %2145 = vrcp.f32 %v1204_v56  ;;  %v1114_v35 = vsel %vm723_vm0, %v2622_v43, 0.0  ;;  %v1081_v23 = vadd.f32 %v1080_v41, %v1079_v22  ;;  %v1226_v63 = vsel %vm723_vm0, %v2636_v44, 0.0 }
 0x1cb   :  { %2147 = vrcp.f32 %v1078_v12  ;;  %v1097_v51 = vadd.f32 %v1096_v59, %v1095_v55  ;;  %v1115_v4 = vrot.slane %v1114_v35, 4  ;;  %v1190_v20 = vadd.f32 %v1189_v45, %v1188_v9 }
 0x1cc   :  { %v2720_v10 = vpop.eup %2135  ;;  %v1195_v7 = vadd.f32 %v1194_v39, %v1193_v52  ;;  %v1212_v13 = vsel %vm723_vm0, %v2674_v15, 0.0  ;;  %v1082_v17 = vrot.slane %v1081_v23, 2  ;;  %v1227_v62 = vrot.slane %v1226_v63, 4 }
 0x1cd   :  { %v1098_v60 = vrot.slane %v1097_v51, 1  ;;  %v1116_v36 = vadd.f32 %v1115_v4, %v1114_v35  ;;  %2149 = vrcp.f32 %v1190_v20  ;;  %v1213_v14 = vrot.slane %v1212_v13, 4 }
 0x1ce   :  { %v2726_v42 = vpop.eup %2137  ;;  %v1196_v37 = vrot.slane %v1195_v7, 1  ;;  %v1100_v3 = vsel %vm723_vm0, %v2624_v49, 0.0  ;;  %v1083_v5 = vadd.f32 %v1082_v17, %v1081_v23  ;;  %v1228_v30 = vadd.f32 %v1227_v62, %v1226_v63 }
 0x1cf   :  { %v1099_v8 = vadd.f32 %v1098_v60, %v1097_v51  ;;  %v1117_v11 = vrot.slane %v1116_v36, 2  ;;  %v1214_v33 = vadd.f32 %v1213_v14, %v1212_v13  ;;  %v1101_v57 = vrot.slane %v1100_v3, 4 }
 0x1d0   :  { %v1197_v27 = vadd.f32 %v1196_v37, %v1195_v7  ;;  %v1121_v6 = vsel %vm723_vm0, %v2632_v1, 0.0  ;;  %v2732_v54 = vpop.eup %2139  ;;  %v1084_v55 = vrot.slane %v1083_v5, 1  ;;  %v1229_v19 = vrot.slane %v1228_v30, 2 }
 0x1d1   :  { %2151 = vrcp.f32 %v1099_v8  ;;  %v1118_v22 = vadd.f32 %v1117_v11, %v1116_v36  ;;  %v2142_v56 = vpop.eup %2141  ;;  %v1215_v9 = vrot.slane %v1214_v33, 2  ;;  %v1102_v52 = vadd.f32 %v1101_v57, %v1100_v3 }
 0x1d2   :  { %2153 = vrcp.f32 %v1197_v27  ;;  %v1122_v12 = vrot.slane %v1121_v6, 4  ;;  %v1303_v59 = vmul.f32 %v2142_v56, %v2506_v53  ;;  %v1085_v41 = vadd.f32 %v1084_v55, %v1083_v5 }
 0x1d3   :  { %v1119_v45 = vrot.slane %v1118_v22, 1  ;;  %v1230_v39 = vadd.f32 %v1229_v19, %v1228_v30  ;;  %v1216_v35 = vadd.f32 %v1215_v9, %v1214_v33  ;;  %v1103_v51 = vrot.slane %v1102_v52, 2 }
 0x1d4   :  { %v1123_v23 = vadd.f32 %v1122_v12, %v1121_v6  ;;  %v1219_v4 = vsel %vm723_vm0, %v2680_v38, 0.0  ;;  %1419 = vperm.xlu1 %1989, %v1303_v59   ;;  %2155 = vrcp.f32 %v1085_v41  ;;  %v1233_v53 = vsel %vm723_vm0, %v2678_v2, 0.0 }
 0x1d5   :  { %v1120_v20 = vadd.f32 %v1119_v45, %v1118_v22  ;;  %v1231_v7 = vrot.slane %v1230_v39, 1  ;;  %v1220_v63 = vrot.slane %v1219_v4, 4  ;;  %v2144_v13 = vpop.eup %2143  ;;  %v1217_v60 = vrot.slane %v1216_v35, 1 }
 0x1d6   :  { %v1104_v17 = vadd.f32 %v1103_v51, %v1102_v52  ;;  %v1124_v36 = vrot.slane %v1123_v23, 2  ;;  %v1281_v37 = vmul.f32 %v2144_v13, %v2557_v18  ;;  %v1234_v6 = vrot.slane %v1233_v53, 4 }
 0x1d7   :  { %v2146_v62 = vpop.eup %2145  ;;  %2157 = vrcp.f32 %v1120_v20  ;;  %v1232_v14 = vadd.f32 %v1231_v7, %v1230_v39  ;;  %v1221_v3 = vadd.f32 %v1220_v63, %v1219_v4  ;;  %v1218_v11 = vadd.f32 %v1217_v60, %v1216_v35 }
 0x1d8   :  { %v2148_v8 = vpop.eup %2147  ;;  %v1313_v5 = vmul.f32 %v2146_v62, %v2568_v0  ;;  %v1105_v30 = vrot.slane %v1104_v17, 1  ;;  %v1125_v27 = vadd.f32 %v1124_v36, %v1123_v23  ;;  %1364 = vperm.xlu1 %1989, %v1281_v37   ;;  %v1142_v18 = vsel %vm723_vm0, %v2683_v16, 0.0 }
 0x1d9   :  { %v1277_v33 = vmul.f32 %v2148_v8, %v2561_v46  ;;  %2159 = vrcp.f32 %v1232_v14  ;;  %v1222_v57 = vrot.slane %v1221_v3, 2  ;;  %v1235_v9 = vadd.f32 %v1234_v6, %v1233_v53 }
 0x1da   :  { %1444 = vperm.xlu0 %1990, %v1313_v5   ;;  %2161 = vrcp.f32 %v1218_v11  ;;  %v1106_v55 = vadd.f32 %v1105_v30, %v1104_v17  ;;  %v1126_v22 = vrot.slane %v1125_v27, 1  ;;  %v2150_v19 = vpop.eup %2149  ;;  %v1143_v0 = vrot.slane %v1142_v18, 4 }
 0x1db   :  { %v1223_v56 = vadd.f32 %v1222_v57, %v1221_v3  ;;  %v1107_v52 = vsel %vm723_vm0, %v2662_v50, 0.0  ;;  %v1309_v12 = vmul.f32 %v2150_v19, %v2611_v48  ;;  %v1236_v45 = vrot.slane %v1235_v9, 2 }
 0x1dc   :  { %2163 = vrcp.f32 %v1106_v55  ;;  %v1127_v46 = vadd.f32 %v1126_v22, %v1125_v27  ;;  %v1108_v59 = vrot.slane %v1107_v52, 4  ;;  %1354 = vperm.xlu1 %1989, %v1277_v33   ;;  %v1144_v39 = vadd.f32 %v1143_v0, %v1142_v18 }
 0x1dd   :  { %v1224_v41 = vrot.slane %v1223_v56, 1  ;;  %v1254_v35 = vsel %vm723_vm0, %v2713_v34, 0.0  ;;  %v1149_v20 = vsel %vm723_vm0, %v2688_v40, 0.0  ;;  %v1237_v13 = vadd.f32 %v1236_v45, %v1235_v9 }
 0x1de   :  { %v2152_v51 = vpop.eup %2151  ;;  %1434 = vperm.xlu0 %1990, %v1309_v12   ;;  %2165 = vrcp.f32 %v1127_v46  ;;  %v1109_v23 = vadd.f32 %v1108_v59, %v1107_v52  ;;  %v1255_v4 = vrot.slane %v1254_v35, 4  ;;  %v1145_v60 = vrot.slane %v1144_v39, 2 }
 0x1df   :  { %v2154_v7 = vpop.eup %2153  ;;  %v1283_v48 = vmul.f32 %v2152_v51, %v2564_v61  ;;  %v1225_v63 = vadd.f32 %v1224_v41, %v1223_v56  ;;  %v1150_v62 = vrot.slane %v1149_v20, 4  ;;  %v1238_v37 = vrot.slane %v1237_v13, 1 }
 0x1e0   :  { %v1311_v17 = vmul.f32 %v2154_v7, %v2616_v21  ;;  %v1110_v36 = vrot.slane %v1109_v23, 2  ;;  %v1256_v53 = vadd.f32 %v1255_v4, %v1254_v35  ;;  %v1146_v14 = vadd.f32 %v1145_v60, %v1144_v39 }
 0x1e1   :  { %2167 = vrcp.f32 %v1225_v63  ;;  %v1128_v3 = vsel %vm723_vm0, %v2685_v32, 0.0  ;;  %v2156_v8 = vpop.eup %2155  ;;  %v1151_v61 = vadd.f32 %v1150_v62, %v1149_v20  ;;  %v1239_v33 = vadd.f32 %v1238_v37, %v1237_v13 }
 0x1e2   :  { %1369 = vperm.xlu0 %1990, %v1283_v48   ;;  %1439 = vperm.xlu1 %1989, %v1311_v17   ;;  %v1111_v5 = vadd.f32 %v1110_v36, %v1109_v23  ;;  %v1257_v11 = vrot.slane %v1256_v53, 2  ;;  %v1129_v30 = vrot.slane %v1128_v3, 4  ;;  %v1279_v27 = vmul.f32 %v2156_v8, %v2601_v58 }
 0x1e3   :  { %v1147_v21 = vrot.slane %v1146_v14, 1  ;;  %v1135_v57 = vsel %vm723_vm0, %v2716_v47, 0.0  ;;  %v1152_v18 = vrot.slane %v1151_v61, 2  ;;  %2169 = vrcp.f32 %v1239_v33 }
 0x1e4   :  { %v2158_v6 = vpop.eup %2157  ;;  %v1112_v55 = vrot.slane %v1111_v5, 1  ;;  %v1258_v22 = vadd.f32 %v1257_v11, %v1256_v53  ;;  %v1130_v19 = vadd.f32 %v1129_v30, %v1128_v3  ;;  %v1136_v0 = vrot.slane %v1135_v57, 4 }
 0x1e5   :  { %v1289_v56 = vmul.f32 %v2158_v6, %v2622_v43  ;;  %v1148_v9 = vadd.f32 %v1147_v21, %v1146_v14  ;;  %v1153_v58 = vadd.f32 %v1152_v18, %v1151_v61  ;;  %v1240_v35 = vsel %vm723_vm0, %v2720_v10, 0.0 }
 0x1e6   :  { %v2160_v52 = vpop.eup %2159  ;;  %1359 = vperm.xlu0 %1990, %v1279_v27   ;;  %v1113_v12 = vadd.f32 %v1112_v55, %v1111_v5  ;;  %v1259_v46 = vrot.slane %v1258_v22, 1  ;;  %v1131_v59 = vrot.slane %v1130_v19, 2  ;;  %v1137_v39 = vadd.f32 %v1136_v0, %v1135_v57 }
 0x1e7   :  { %v2162_v41 = vpop.eup %2161  ;;  %1384 = vperm.xlu1 %1989, %v1289_v56   ;;  %v1321_v45 = vmul.f32 %v2160_v52, %v2636_v44  ;;  %2171 = vrcp.f32 %v1148_v9  ;;  %v1154_v23 = vrot.slane %v1153_v58, 1  ;;  %v1241_v48 = vrot.slane %v1240_v35, 4 }
 0x1e8   :  { %v1317_v43 = vmul.f32 %v2162_v41, %v2674_v15  ;;  %2173 = vrcp.f32 %v1113_v12  ;;  %v1260_v51 = vadd.f32 %v1259_v46, %v1258_v22  ;;  %v1132_v20 = vadd.f32 %v1131_v59, %v1130_v19 }
 0x1e9   :  { %v2164_v4 = vpop.eup %2163  ;;  %v1138_v7 = vrot.slane %v1137_v39, 2  ;;  %v1247_v63 = vsel %vm723_vm0, %v2732_v54, 0.0  ;;  %v1155_v13 = vadd.f32 %v1154_v23, %v1153_v58  ;;  %v1242_v53 = vadd.f32 %v1241_v48, %v1240_v35 }
 0x1ea   :  { %1454 = vperm.xlu0 %1990, %v1317_v43   ;;  %v1285_v44 = vmul.f32 %v2164_v4, %v2624_v49  ;;  %2175 = vrcp.f32 %v1260_v51  ;;  %v1248_v60 = vrot.slane %v1247_v63, 4  ;;  %v1133_v36 = vrot.slane %v1132_v20, 1 }
 0x1eb   :  { %v2166_v17 = vpop.eup %2165  ;;  %1464 = vperm.xlu1 %1989, %v1321_v45   ;;  %v1139_v15 = vadd.f32 %v1138_v7, %v1137_v39  ;;  %v1205_v62 = vsel %vm723_vm0, %v2614_v24, 0.0  ;;  %2177 = vrcp.f32 %v1155_v13  ;;  %v1243_v11 = vrot.slane %v1242_v53, 2 }
 0x1ec   :  { %v1291_v37 = vmul.f32 %v2166_v17, %v2632_v1  ;;  %v1249_v14 = vadd.f32 %v1248_v60, %v1247_v63  ;;  %v1206_v3 = vrot.slane %v1205_v62, 4  ;;  %v1134_v8 = vadd.f32 %v1133_v36, %v1132_v20 }
 0x1ed   :  { %v1140_v5 = vrot.slane %v1139_v15, 1  ;;  %v1261_v49 = vsel %vm723_vm0, %v2726_v42, 0.0  ;;  %v1244_v57 = vadd.f32 %v1243_v11, %v1242_v53 }
 0x1ee   :  { %v2168_v61 = vpop.eup %2167  ;;  %1389 = vperm.xlu0 %1990, %v1291_v37   ;;  %v1250_v30 = vrot.slane %v1249_v14, 2  ;;  %v1207_v27 = vadd.f32 %v1206_v3, %v1205_v62  ;;  %v1262_v33 = vrot.slane %v1261_v49, 4  ;;  %2179 = vrcp.f32 %v1134_v8 }
 0x1ef   :  { %1374 = vperm.xlu1 %1989, %v1285_v44   ;;  %v1141_v21 = vadd.f32 %v1140_v5, %v1139_v15  ;;  %v1319_v22 = vmul.f32 %v2168_v61, %v2680_v38  ;;  %v1245_v18 = vrot.slane %v1244_v57, 1 }
 0x1f0   :  { %v1251_v6 = vadd.f32 %v1250_v30, %v1249_v14  ;;  %v1208_v1 = vrot.slane %v1207_v27, 2  ;;  %v1263_v55 = vadd.f32 %v1262_v33, %v1261_v49  ;;  %v2170_v19 = vpop.eup %2169  ;;  %v2936_v49 = vld [vmem:[#allocation3_spill] sm:$0xff] }
 0x1f1   :  { %2181 = vrcp.f32 %v1141_v21  ;;  %v1323_v52 = vmul.f32 %v2170_v19, %v2678_v2  ;;  %v1246_v12 = vadd.f32 %v1245_v18, %v1244_v57  ;;  %v2937_v21 = vld [vmem:[#allocation2_spill] sm:$0xff] }
 0x1f2   :  { %v1252_v56 = vrot.slane %v1251_v6, 1  ;;  %v1209_v9 = vadd.f32 %v1208_v1, %v1207_v27  ;;  %v1264_v0 = vrot.slane %v1263_v55, 2  ;;  %v2938_v1 = vld [vmem:[#allocation4_spill] sm:$0xff] }
 0x1f3   :  { %1459 = vperm.xlu1 %1989, %v1319_v22   ;;  %1469 = vperm.xlu0 %1990, %v1323_v52   ;;  %2183 = vrcp.f32 %v1246_v12 }
 0x1f4   :  { %v2172_v46 = vpop.eup %2171  ;;  %v1253_v58 = vadd.f32 %v1252_v56, %v1251_v6  ;;  %v1210_v59 = vrot.slane %v1209_v9, 1  ;;  %v1265_v41 = vadd.f32 %v1264_v0, %v1263_v55 }
 0x1f5   :  { %v2174_v45 = vpop.eup %2173  ;;  %v1297_v39 = vmul.f32 %v2172_v46, %v2683_v16  ;;  %v2939_v46 = vld [vmem:[#allocation5_spill] sm:$0xff] }
 0x1f6   :  { %2185 = vrcp.f32 %v1253_v58  ;;  %v1211_v38 = vadd.f32 %v1210_v59, %v1209_v9  ;;  %v1266_v35 = vrot.slane %v1265_v41, 1  ;;  %v1287_v51 = vmul.f32 %v2174_v45, %v2662_v50 }
 0x1f7   :  { %v2176_v43 = vpop.eup %2175  ;;  %1404 = vperm.xlu1 %1989, %v1297_v39  }
 0x1f8   :  { %v1329_v23 = vmul.f32 %v2176_v43, %v2713_v34  ;;  %2187 = vrcp.f32 %v1211_v38  ;;  %v1267_v2 = vadd.f32 %v1266_v35, %v1265_v41  ;;  %v2178_v4 = vpop.eup %2177  ;;  %1379 = vperm.xlu0 %1990, %v1287_v51   ;;  %v2940_v35 = vld [vmem:[#allocation6_spill] sm:$0xff] }
 0x1f9   :  { %v1299_v20 = vmul.f32 %v2178_v4, %v2688_v40 }
 0x1fa   :  { %2189 = vrcp.f32 %v1267_v2 }
 0x1fb   :  { %1484 = vperm.xlu1 %1989, %v1329_v23   ;;  %v2180_v7 = vpop.eup %2179 }
 0x1fc   :  { %1409 = vperm.xlu0 %1990, %v1299_v20   ;;  %v1293_v16 = vmul.f32 %v2180_v7, %v2685_v32 }
 0x1fe   :  { %v2182_v48 = vpop.eup %2181 }
 0x1ff   :  { %1394 = vperm.xlu1 %1989, %v1293_v16   ;;  %v1295_v63 = vmul.f32 %v2182_v48, %v2716_v47 }
 0x200   :  { %v2184_v50 = vpop.eup %2183 }
 0x201   :  { %1399 = vperm.xlu0 %1990, %v1295_v63   ;;  %v1325_v34 = vmul.f32 %v2184_v50, %v2720_v10 }
 0x203   :  { %v2186_v44 = vpop.eup %2185  ;;  %1474 = vperm.xlu1 %1989, %v1325_v34   ;;  %v2941_v34 = vld [vmem:[#allocation8_spill] sm:$0xff] }
 0x204   :  { %v1327_v13 = vmul.f32 %v2186_v44, %v2732_v54 }
 0x205   :  { %v2188_v60 = vpop.eup %2187 }
 0x206   :  { %1479 = vperm.xlu0 %1990, %v1327_v13   ;;  %v1315_v40 = vmul.f32 %v2188_v60, %v2614_v24 }
 0x207   :  { %v2190_v17 = vpop.eup %2189 }
 0x208   :  { %v1331_v36 = vmul.f32 %v2190_v17, %v2726_v42  ;;  %1449 = vperm.xlu1 %1989, %v1315_v40  }
 0x20a   :  { %1489 = vperm.xlu0 %1990, %v1331_v36  }
 0x230   :  { %v1345_v15 = vpop.permute.xlu1 %1344 }
 0x231   :  { %v1494_v10 = vmul.f32 %v2352_v25, %v1345_v15 }
 0x233   :  { %v1536_v8 = vrot.slane %v1494_v10, 4 }
 0x234   :  { %v1425_v32 = vpop.permute.xlu0 %1424 }
 0x235   :  { %v1510_v54 = vmul.f32 %v2360_v28, %v1425_v32  ;;  %v1537_v25 = vadd.f32 %v1536_v8, %v1494_v10 }
 0x237   :  { %v1632_v5 = vrot.slane %v1510_v54, 4  ;;  %v1538_v19 = vrot.slane %v1537_v25, 2 }
 0x238   :  { %v1335_v53 = vpop.permute.xlu0 %1334 }
 0x239   :  { %v1492_v24 = vmul.f32 %v1335_v53, %v2355_v26  ;;  %v1633_v6 = vadd.f32 %v1632_v5, %v1510_v54  ;;  %v1539_v38 = vadd.f32 %v1538_v19, %v1537_v25 }
 0x23b   :  { %v1524_v27 = vrot.slane %v1492_v24, 4  ;;  %v1634_v9 = vrot.slane %v1633_v6, 2  ;;  %v1540_v44 = vrot.slane %v1539_v38, 1 }
 0x23d   :  { %v1430_v47 = vpop.permute.xlu1 %1429  ;;  %v1525_v22 = vadd.f32 %v1524_v27, %v1492_v24  ;;  %v1635_v23 = vadd.f32 %v1634_v9, %v1633_v6  ;;  %v1541_v24 = vadd.f32 %v1540_v44, %v1539_v38 }
 0x23e   :  { %v1511_v3 = vmul.f32 %v2370_v31, %v1430_v47  ;;  %v2942_v47 = vld [vmem:[#allocation7_spill] sm:$0xff] }
 0x23f   :  { %v1526_v41 = vrot.slane %v1525_v22, 2  ;;  %v1636_v36 = vrot.slane %v1635_v23, 1 }
 0x240   :  { %v1638_v30 = vrot.slane %v1511_v3, 4 }
 0x241   :  { %v1415_v37 = vpop.permute.xlu0 %1414  ;;  %v1527_v63 = vadd.f32 %v1526_v41, %v1525_v22 }
 0x242   :  { %v1508_v61 = vmul.f32 %v1415_v37, %v2936_v49  ;;  %v1639_v31 = vadd.f32 %v1638_v30, %v1511_v3 }
 0x243   :  { %v1340_v62 = vpop.permute.xlu1 %1339 }
 0x244   :  { %v1493_v14 = vmul.f32 %v1340_v62, %v2364_v29  ;;  %v1620_v55 = vrot.slane %v1508_v61, 4  ;;  %v1640_v59 = vrot.slane %v1639_v31, 2 }
 0x245   :  { %v1350_v42 = vpop.permute.xlu0 %1349 }
 0x246   :  { %v1530_v11 = vrot.slane %v1493_v14, 4  ;;  %v1495_v57 = vmul.f32 %v2937_v21, %v1350_v42  ;;  %v1621_v12 = vadd.f32 %v1620_v55, %v1508_v61  ;;  %v1641_v48 = vadd.f32 %v1640_v59, %v1639_v31  ;;  %v2943_v42 = vld [vmem:[#allocation9_spill] sm:$0xff]  ;;  %v2944_v21 = vld [vmem:[#allocation10_spill] sm:$0xff] }
 0x247   :  { %v2796_v61 = vadd.f32 %v1636_v36, %v1635_v23  ;;  %v2946_v59 = vld [vmem:[#allocation17_spill] sm:$0xff]  ;;  %v2948_v23 = vld [vmem:[#allocation14_spill] sm:$0xff] }
 0x248   :  { %v1531_v28 = vadd.f32 %v1530_v11, %v1493_v14  ;;  %v1542_v26 = vrot.slane %v1495_v57, 4  ;;  %v1622_v20 = vrot.slane %v1621_v12, 2  ;;  %v1642_v54 = vrot.slane %v1641_v48, 1 }
 0x249   :  { %v1528_v14 = vrot.slane %v1527_v63, 1 }
 0x24a   :  { %v1532_v0 = vrot.slane %v1531_v28, 2  ;;  %v1543_v45 = vadd.f32 %v1542_v26, %v1495_v57  ;;  %v1623_v62 = vadd.f32 %v1622_v20, %v1621_v12 }
 0x24b   :  { %v1529_v55 = vadd.f32 %v1528_v14, %v1527_v63 }
 0x24c   :  { %v1533_v2 = vadd.f32 %v1532_v0, %v1531_v28  ;;  %v1544_v50 = vrot.slane %v1543_v45, 2  ;;  %v1624_v25 = vrot.slane %v1623_v62, 1 }
 0x24e   :  { %v1534_v32 = vrot.slane %v1533_v2, 1  ;;  %v1545_v3 = vadd.f32 %v1544_v50, %v1543_v45  ;;  %v1625_v45 = vadd.f32 %v1624_v25, %v1623_v62 }
 0x24f   :  { %v1420_v33 = vpop.permute.xlu1 %1419 }
 0x250   :  { %v1509_v29 = vmul.f32 %v1420_v33, %v2938_v1  ;;  %v1535_v30 = vadd.f32 %v1534_v32, %v1533_v2  ;;  %v1546_v31 = vrot.slane %v1545_v3, 1 }
 0x252   :  { %v1626_v52 = vrot.slane %v1509_v29, 4 }
 0x253   :  { %v1365_v18 = vpop.permute.xlu1 %1364 }
 0x254   :  { %v1498_v58 = vmul.f32 %v2939_v46, %v1365_v18  ;;  %v1627_v4 = vadd.f32 %v1626_v52, %v1509_v29  ;;  %v2799_v29 = vadd.f32 %v1642_v54, %v1641_v48  ;;  %v1749_v52 = vsel %vm1748_vm1, %v1535_v30, %v1529_v55 }
 0x255   :  { %v1445_v56 = vpop.permute.xlu0 %1444 }
 0x256   :  { %v1560_v7 = vrot.slane %v1498_v58, 4  ;;  %v1514_v13 = vmul.f32 %v2941_v34, %v1445_v56  ;;  %v1628_v15 = vrot.slane %v1627_v4, 2  ;;  %v2945_v56 = vld [vmem:[#allocation11_spill] sm:$0xff] }
 0x257   :  { %v1355_v39 = vpop.permute.xlu1 %1354 }
 0x258   :  { %v1496_v43 = vmul.f32 %v1355_v39, %v2940_v35  ;;  %v1561_v37 = vadd.f32 %v1560_v7, %v1498_v58  ;;  %v1656_v8 = vrot.slane %v1514_v13, 4  ;;  %v1629_v27 = vadd.f32 %v1628_v15, %v1627_v4  ;;  %v2947_v35 = vld [vmem:[#allocation15_spill] sm:$0xff] }
 0x259   :  { %v1435_v51 = vpop.permute.xlu0 %1434  ;;  %v1751_v7 = vsel %vm1750_vm2, %v1541_v24, %v1749_v52 }
 0x25a   :  { %v1548_v16 = vrot.slane %v1496_v43, 4  ;;  %v1512_v5 = vmul.f32 %v1435_v51, %v2943_v42  ;;  %v1562_v6 = vrot.slane %v1561_v37, 2  ;;  %v1657_v26 = vadd.f32 %v1656_v8, %v1514_v13 }
 0x25b   :  { %v1630_v12 = vrot.slane %v1629_v27, 1  ;;  %v1547_v51 = vadd.f32 %v1546_v31, %v1545_v3 }
 0x25c   :  { %v1549_v60 = vadd.f32 %v1548_v16, %v1496_v43  ;;  %v1644_v18 = vrot.slane %v1512_v5, 4  ;;  %v1563_v39 = vadd.f32 %v1562_v6, %v1561_v37  ;;  %v1658_v16 = vrot.slane %v1657_v26, 2 }
 0x25d   :  { %v1440_v17 = vpop.permute.xlu1 %1439  ;;  %v1370_v40 = vpop.permute.xlu0 %1369  ;;  %v1631_v44 = vadd.f32 %v1630_v12, %v1629_v27  ;;  %v1753_v62 = vsel %vm1752_vm3, %v1547_v51, %v1751_v7  ;;  %v2954_v7 = vld [vmem:[#allocation18_spill] sm:$0xff] }
 0x25e   :  { %v1499_v53 = vmul.f32 %v2942_v47, %v1370_v40  ;;  %v1550_v10 = vrot.slane %v1549_v60, 2  ;;  %v1513_v2 = vmul.f32 %v1440_v17, %v2948_v23  ;;  %v1645_v48 = vadd.f32 %v1644_v18, %v1512_v5  ;;  %v2949_v40 = vld [vmem:[#allocation16_spill] sm:$0xff] }
 0x25f   :  { %v1564_v32 = vrot.slane %v1563_v39, 1  ;;  %v2810_v14 = vadd.f32 %v1658_v16, %v1657_v26  ;;  %v1769_v42 = vsel %vm1748_vm1, %v1631_v44, %v1625_v45  ;;  %v2953_v45 = vld [vmem:[#allocation20_spill] sm:$0xff] }
 0x260   :  { %v1566_v11 = vrot.slane %v1499_v53, 4  ;;  %v1551_v28 = vadd.f32 %v1550_v10, %v1549_v60  ;;  %v1650_v37 = vrot.slane %v1513_v2, 4  ;;  %v1646_v3 = vrot.slane %v1645_v48, 2 }
 0x261   :  { %v1360_v49 = vpop.permute.xlu0 %1359  ;;  %v1565_v27 = vadd.f32 %v1564_v32, %v1563_v39 }
 0x262   :  { %v1385_v33 = vpop.permute.xlu1 %1384  ;;  %v1497_v57 = vmul.f32 %v1360_v49, %v2944_v21  ;;  %v1567_v1 = vadd.f32 %v1566_v11, %v1499_v53  ;;  %v1552_v38 = vrot.slane %v1551_v28, 1  ;;  %v2950_v53 = vld [vmem:[#allocation13_spill] sm:$0xff]  ;;  %v1651_v6 = vadd.f32 %v1650_v37, %v1513_v2 }
 0x263   :  { %v1502_v9 = vmul.f32 %v2945_v56, %v1385_v33 }
 0x264   :  { %v1554_v22 = vrot.slane %v1497_v57, 4  ;;  %v1568_v19 = vrot.slane %v1567_v1, 2  ;;  %v1553_v15 = vadd.f32 %v1552_v38, %v1551_v28  ;;  %v1660_v38 = vrot.slane %v2810_v14, 1 }
 0x265   :  { %v1455_v0 = vpop.permute.xlu0 %1454  ;;  %v1584_v63 = vrot.slane %v1502_v9, 4 }
 0x266   :  { %v1555_v46 = vadd.f32 %v1554_v22, %v1497_v57  ;;  %v1465_v58 = vpop.permute.xlu1 %1464  ;;  %v1516_v41 = vmul.f32 %v1455_v0, %v2946_v59  ;;  %v1569_v4 = vadd.f32 %v1568_v19, %v1567_v1  ;;  %v1755_v33 = vsel %vm1754_vm4, %v1553_v15, %v1753_v62  ;;  %v2951_v57 = vld [vmem:[#allocation21_spill] sm:$0xff]  ;;  %v2952_v0 = vld [vmem:[#allocation19_spill] sm:$0xff] }
 0x267   :  { %v1518_v43 = vmul.f32 %v2947_v35, %v1465_v58  ;;  %v1585_v24 = vadd.f32 %v1584_v63, %v1502_v9  ;;  %v1647_v22 = vadd.f32 %v1646_v3, %v1645_v48  ;;  %v1770_v58 = vsel %vm1750_vm2, %v2796_v61, %v1769_v42 }
 0x268   :  { %v1556_v20 = vrot.slane %v1555_v46, 2  ;;  %v1668_v13 = vrot.slane %v1516_v41, 4  ;;  %v1570_v10 = vrot.slane %v1569_v4, 1  ;;  %v1652_v35 = vrot.slane %v1651_v6, 2 }
 0x269   :  { %v1390_v50 = vpop.permute.xlu0 %1389  ;;  %v1680_v47 = vrot.slane %v1518_v43, 4  ;;  %v1586_v26 = vrot.slane %v1585_v24, 2  ;;  %v1648_v61 = vrot.slane %v1647_v22, 1 }
 0x26a   :  { %v1557_v34 = vadd.f32 %v1556_v20, %v1555_v46  ;;  %v1375_v60 = vpop.permute.xlu1 %1374  ;;  %v1503_v36 = vmul.f32 %v2949_v40, %v1390_v50  ;;  %v1669_v11 = vadd.f32 %v1668_v13, %v1516_v41  ;;  %v1571_v28 = vadd.f32 %v1570_v10, %v1569_v4 }
 0x26b   :  { %v1500_v17 = vmul.f32 %v1375_v60, %v2950_v53  ;;  %v1681_v21 = vadd.f32 %v1680_v47, %v1518_v43  ;;  %v1587_v2 = vadd.f32 %v1586_v26, %v1585_v24  ;;  %v2955_v47 = vld [vmem:[#allocation24_spill] sm:$0xff]  ;;  %v2835_v24 = vadd.f32 %v1648_v61, %v1647_v22 }
 0x26c   :  { %v1558_v54 = vrot.slane %v1557_v34, 1  ;;  %v1590_v49 = vrot.slane %v1503_v36, 4  ;;  %v1670_v56 = vrot.slane %v1669_v11, 2  ;;  %v2960_v61 = vld [vmem:[#allocation28_spill] sm:$0xff] }
 0x26d   :  { %v1572_v8 = vrot.slane %v1500_v17, 4  ;;  %v1682_v59 = vrot.slane %v1681_v21, 2  ;;  %v1588_v62 = vrot.slane %v1587_v2, 1 }
 0x26e   :  { %v1559_v5 = vadd.f32 %v1558_v54, %v1557_v34  ;;  %v1460_v30 = vpop.permute.xlu1 %1459  ;;  %v1470_v31 = vpop.permute.xlu0 %1469  ;;  %v1591_v9 = vadd.f32 %v1590_v49, %v1503_v36  ;;  %v1671_v48 = vadd.f32 %v1670_v56, %v1669_v11  ;;  %v2829_v34 = vsel %vm1752_vm3, %v2799_v29, %v1770_v58  ;;  %v2956_v54 = vld [vmem:[#allocation23_spill] sm:$0xff] }
 0x26f   :  { %v1517_v25 = vmul.f32 %v1460_v30, %v2951_v57  ;;  %v1573_v55 = vadd.f32 %v1572_v8, %v1500_v17  ;;  %v1519_v52 = vmul.f32 %v2952_v0, %v1470_v31  ;;  %v1683_v13 = vadd.f32 %v1682_v59, %v1681_v21 }
 0x270   :  { %v1757_v1 = vsel %vm1756_vm5, %v1559_v5, %v1755_v33  ;;  %v1592_v63 = vrot.slane %v1591_v9, 2  ;;  %v2831_v36 = vadd.f32 %v1652_v35, %v1651_v6  ;;  %v1672_v8 = vrot.slane %v1671_v48, 1 }
 0x271   :  { %v1759_v18 = vsel %vm1758_vm7, %v1565_v27, %v1757_v1  ;;  %v1674_v19 = vrot.slane %v1517_v25, 4  ;;  %v1574_v43 = vrot.slane %v1573_v55, 2  ;;  %v1686_v51 = vrot.slane %v1519_v52, 4 }
 0x272   :  { %v1405_v12 = vpop.permute.xlu1 %1404  ;;  %v1761_v46 = vsel %vm1760_vm6, %v1571_v28, %v1759_v18  ;;  %v1593_v29 = vadd.f32 %v1592_v63, %v1591_v9  ;;  %v1684_v11 = vrot.slane %v1683_v13, 1  ;;  %v1654_v1 = vrot.slane %v2831_v36, 1 }
 0x273   :  { %v1675_v41 = vadd.f32 %v1674_v19, %v1517_v25  ;;  %v1506_v39 = vmul.f32 %v2953_v45, %v1405_v12  ;;  %1787 = vst [vmem:[%s2879_s2] sm:$0xff] %v1761_v46  ;;  %v1380_v23 = vpop.permute.xlu0 %1379  ;;  %v1687_v50 = vadd.f32 %v1686_v51, %v1519_v52  ;;  %v1575_v32 = vadd.f32 %v1574_v43, %v1573_v55  ;;  %v2957_v25 = vld [vmem:[#allocation22_spill] sm:$0xff] }
 0x274   :  { %v1501_v16 = vmul.f32 %v1380_v23, %v2954_v7  ;;  %v1589_v55 = vadd.f32 %v1588_v62, %v1587_v2  ;;  %v1673_v26 = vadd.f32 %v1672_v8, %v1671_v48  ;;  %v1594_v18 = vrot.slane %v1593_v29, 1  ;;  %v2958_v12 = vld [vmem:[#allocation26_spill] sm:$0xff]  ;;  %v2959_v23 = vld [vmem:[#allocation25_spill] sm:$0xff]  ;;  %v2961_v8 = vld [vmem:[#allocation12_spill] sm:$0xff] }
 0x275   :  { %v1676_v4 = vrot.slane %v1675_v41, 2  ;;  %v1608_v20 = vrot.slane %v1506_v39, 4  ;;  %v1688_v42 = vrot.slane %v1687_v50, 2  ;;  %v1576_v33 = vrot.slane %v1575_v32, 1 }
 0x276   :  { %v1485_v44 = vpop.permute.xlu1 %1484  ;;  %v1578_v40 = vrot.slane %v1501_v16, 4  ;;  %v1685_v9 = vadd.f32 %v1684_v11, %v1683_v13 }
 0x277   :  { %v1677_v60 = vadd.f32 %v1676_v4, %v1675_v41  ;;  %v1609_v15 = vadd.f32 %v1608_v20, %v1506_v39  ;;  %v1522_v53 = vmul.f32 %v2955_v47, %v1485_v44  ;;  %v1410_v17 = vpop.permute.xlu0 %1409  ;;  %v1689_v19 = vadd.f32 %v1688_v42, %v1687_v50  ;;  %v2962_v42 = vld [vmem:[#allocation27_spill] sm:$0xff] }
 0x278   :  { %v1579_v10 = vadd.f32 %v1578_v40, %v1501_v16  ;;  %v1507_v3 = vmul.f32 %v2956_v54, %v1410_v17  ;;  %v1577_v58 = vadd.f32 %v1576_v33, %v1575_v32  ;;  %v1595_v20 = vadd.f32 %v1594_v18, %v1593_v29 }
 0x279   :  { %v1678_v37 = vrot.slane %v1677_v60, 1  ;;  %v1704_v30 = vrot.slane %v1522_v53, 4  ;;  %v1610_v57 = vrot.slane %v1609_v15, 2  ;;  %v1690_v7 = vrot.slane %v1689_v19, 1 }
 0x27a   :  { %v1395_v5 = vpop.permute.xlu1 %1394  ;;  %v1580_v49 = vrot.slane %v1579_v10, 2  ;;  %v1614_v27 = vrot.slane %v1507_v3, 4 }
 0x27b   :  { %v1679_v21 = vadd.f32 %v1678_v37, %v1677_v60  ;;  %v1504_v6 = vmul.f32 %v1395_v5, %v2957_v25  ;;  %v1705_v52 = vadd.f32 %v1704_v30, %v1522_v53  ;;  %v1611_v41 = vadd.f32 %v1610_v57, %v1609_v15 }
 0x27c   :  { %v1400_v28 = vpop.permute.xlu0 %1399  ;;  %v1581_v31 = vadd.f32 %v1580_v49, %v1579_v10  ;;  %v1615_v22 = vadd.f32 %v1614_v27, %v1507_v3  ;;  %v1691_v11 = vadd.f32 %v1690_v7, %v1689_v19 }
 0x27d   :  { %v1596_v56 = vrot.slane %v1504_v6, 4  ;;  %v1505_v46 = vmul.f32 %v1400_v28, %v2958_v12  ;;  %v1776_v59 = vsel %vm1748_vm1, %v1679_v21, %v1673_v26  ;;  %v1706_v50 = vrot.slane %v1705_v52, 2 }
 0x27e   :  { %v1582_v0 = vrot.slane %v1581_v31, 1  ;;  %v1475_v39 = vpop.permute.xlu1 %1474  ;;  %v1616_v43 = vrot.slane %v1615_v22, 2  ;;  %v1777_v60 = vsel %vm1750_vm2, %v1685_v9, %v1776_v59  ;;  %v1612_v40 = vrot.slane %v1611_v41, 1 }
 0x27f   :  { %v1597_v45 = vadd.f32 %v1596_v56, %v1504_v6  ;;  %v1602_v51 = vrot.slane %v1505_v46, 4  ;;  %v1520_v2 = vmul.f32 %v1475_v39, %v2959_v23  ;;  %v1707_v49 = vadd.f32 %v1706_v50, %v1705_v52 }
 0x280   :  { %v1583_v35 = vadd.f32 %v1582_v0, %v1581_v31  ;;  %v1617_v17 = vadd.f32 %v1616_v43, %v1615_v22  ;;  %v1655_v9 = vadd.f32 %v1654_v1, %v2831_v36  ;;  %v1613_v19 = vadd.f32 %v1612_v40, %v1611_v41 }
 0x281   :  { %v1480_v4 = vpop.permute.xlu0 %1479  ;;  %v1598_v16 = vrot.slane %v1597_v45, 2  ;;  %v1603_v44 = vadd.f32 %v1602_v51, %v1505_v46  ;;  %v1692_v13 = vrot.slane %v1520_v2, 4  ;;  %v1778_v12 = vsel %vm1752_vm3, %v1691_v11, %v1777_v60 }
 0x282   :  { %v1521_v48 = vmul.f32 %v1480_v4, %v2960_v61  ;;  %v1762_v63 = vsel %vm1748_vm1, %v1583_v35, %v1577_v58  ;;  %v1618_v6 = vrot.slane %v1617_v17, 1  ;;  %v1772_v36 = vsel %vm1754_vm4, %v2835_v24, %v2829_v34 }
 0x283   :  { %v1599_v32 = vadd.f32 %v1598_v16, %v1597_v45  ;;  %v1450_v47 = vpop.permute.xlu1 %1449  ;;  %v1763_v53 = vsel %vm1750_vm2, %v1589_v55, %v1762_v63  ;;  %v1604_v62 = vrot.slane %v1603_v44, 2  ;;  %v1693_v37 = vadd.f32 %v1692_v13, %v1520_v2 }
 0x284   :  { %v1698_v15 = vrot.slane %v1521_v48, 4  ;;  %v1515_v29 = vmul.f32 %v2961_v8, %v1450_v47  ;;  %v1764_v28 = vsel %vm1752_vm3, %v1595_v20, %v1763_v53  ;;  %v1708_v45 = vrot.slane %v1707_v49, 1 }
 0x285   :  { %v1490_v10 = vpop.permute.xlu0 %1489  ;;  %v1600_v54 = vrot.slane %v1599_v32, 1  ;;  %v1605_v30 = vadd.f32 %v1604_v62, %v1603_v44  ;;  %v1694_v27 = vrot.slane %v1693_v37, 2  ;;  %v1619_v39 = vadd.f32 %v1618_v6, %v1617_v17 }
 0x286   :  { %v1699_v3 = vadd.f32 %v1698_v15, %v1521_v48  ;;  %v1523_v5 = vmul.f32 %v2962_v42, %v1490_v10  ;;  %v1662_v57 = vrot.slane %v1515_v29, 4  ;;  %v1773_v20 = vsel %vm1756_vm5, %v1655_v9, %v1772_v36 }
 0x287   :  { %v1601_v33 = vadd.f32 %v1600_v54, %v1599_v32  ;;  %v1606_v55 = vrot.slane %v1605_v30, 1  ;;  %v1695_v31 = vadd.f32 %v1694_v27, %v1693_v37  ;;  %v1661_v48 = vadd.f32 %v1660_v38, %v2810_v14 }
 0x288   :  { %v1700_v21 = vrot.slane %v1699_v3, 2  ;;  %v1710_v25 = vrot.slane %v1523_v5, 4  ;;  %v1663_v18 = vadd.f32 %v1662_v57, %v1515_v29  ;;  %v1709_v63 = vadd.f32 %v1708_v45, %v1707_v49 }
 0x289   :  { %v1765_v22 = vsel %vm1754_vm4, %v1601_v33, %v1764_v28  ;;  %v1607_v0 = vadd.f32 %v1606_v55, %v1605_v30  ;;  %v1696_v52 = vrot.slane %v1695_v31, 1  ;;  %v1774_v50 = vsel %vm1758_vm7, %v1661_v48, %v1773_v20 }
 0x28a   :  { %v1701_v26 = vadd.f32 %v1700_v21, %v1699_v3  ;;  %v1711_v56 = vadd.f32 %v1710_v25, %v1523_v5  ;;  %v1664_v58 = vrot.slane %v1663_v18, 2 }
 0x28b   :  { %v1766_v35 = vsel %vm1756_vm5, %v1607_v0, %v1765_v22  ;;  %v1697_v43 = vadd.f32 %v1696_v52, %v1695_v31 }
 0x28c   :  { %v1702_v46 = vrot.slane %v1701_v26, 1  ;;  %v1712_v59 = vrot.slane %v1711_v56, 2  ;;  %v1767_v51 = vsel %vm1758_vm7, %v1613_v19, %v1766_v35  ;;  %v1665_v2 = vadd.f32 %v1664_v58, %v1663_v18 }
 0x28d   :  { %v1779_v1 = vsel %vm1754_vm4, %v1697_v43, %v1778_v12  ;;  %v1768_v41 = vsel %vm1760_vm6, %v1619_v39, %v1767_v51 }
 0x28e   :  { %v1703_v23 = vadd.f32 %v1702_v46, %v1701_v26  ;;  %v1713_v4 = vadd.f32 %v1712_v59, %v1711_v56  ;;  %v1666_v16 = vrot.slane %v1665_v2, 1  ;;  %1788 = vst [vmem:[%s2879_s2 + $0x8] sm:$0xff] %v1768_v41 }
 0x290   :  { %v1780_v7 = vsel %vm1756_vm5, %v1703_v23, %v1779_v1  ;;  %v1714_v61 = vrot.slane %v1713_v4, 1  ;;  %v1667_v34 = vadd.f32 %v1666_v16, %v1665_v2 }
 0x291   :  { %v1781_v44 = vsel %vm1758_vm7, %v1709_v63, %v1780_v7 }
 0x292   :  { %v1715_v24 = vadd.f32 %v1714_v61, %v1713_v4  ;;  %v1775_v13 = vsel %vm1760_vm6, %v1667_v34, %v1774_v50 }
 0x293   :  { %1789 = vst [vmem:[%s2879_s2 + $0x10] sm:$0xff] %v1775_v13 }
 0x294   :  { %v1782_v60 = vsel %vm1760_vm6, %v1715_v24, %v1781_v44 }
 0x295   :  { %1790 = vst [vmem:[%s2879_s2 + $0x18] sm:$0xff] %v1782_v60 }

</bundles_post_ra>
